<compile_context>
chip_gen: v7x
topology: tpu7x:2x2x1
jax: 0.10.0
libtpu: 0.0.40
codegen_flags: <defaults>
</compile_context>

<pallas_src>
import functools

import jax
import jax.numpy as jnp
from jax.experimental import pallas as pl
from jax.experimental.pallas import tpu as pltpu


def _round_up(x, m):
    return (x + m - 1) // m * m


# ----------------------------------------------------------------------------
# Hardware query (trace-time, with safe fallbacks).
# ----------------------------------------------------------------------------
def _tpu_hardware():
    """Returns (physical_vmem_bytes, tensorcores_per_chip)."""
    dev = jax.devices()[0]
    kind = str(getattr(dev, "device_kind", "")).lower()
    vmem = None
    try:
        vmem = int(pltpu.get_tpu_info().vmem_capacity_bytes)
    except Exception:
        vmem = None
    if not vmem or vmem <= 0:
        vmem = (64 if "v7" in kind else 128) * 1024 * 1024
    cores = getattr(dev, "num_cores", None)
    if not isinstance(cores, int) or cores < 1 or cores > 2:
        cores = 2 if any(t in kind for t in ("v4", "v5p", "v7")) else 1
    return vmem, cores


def _derive_time_chunk(T, bb, E, H, in_dtype, out_dtype, budget_bytes, cap):
    """Largest time chunk whose VMEM footprint fits the budget."""
    cd = jnp.dtype(in_dtype).itemsize
    od = jnp.dtype(out_dtype).itemsize
    # Chunk-size-independent residents: single-buffered weights + bias,
    # double-buffered h/c state blocks, compute-dtype h scratch.
    fixed = ((E + H) * 4 * H * cd
             + 4 * H * 4
             + 2 * 2 * bb * H * 4
             + bb * H * cd)
    # Per-timestep: double-buffered input & output blocks + f32 gih scratch.
    per_t = bb * (2 * E * cd + 2 * H * od + 4 * H * 4)
    tc = int(max(budget_bytes - fixed, per_t) // per_t)
    return max(1, min(tc, T, cap))


# ----------------------------------------------------------------------------
# Pallas kernel: one LSTM layer, grid = (batch_blocks, time_chunks).
# ----------------------------------------------------------------------------
def _lstm_chunk_kernel(x_ref, wih_ref, whh_ref, b_ref,      # inputs
                       out_ref, h_ref, c_ref,                # outputs
                       gih_scr, hcd_scr,                     # VMEM scratch
                       *, seq_len):
    chunk = pl.program_id(1)
    tc, bb, e_in = x_ref.shape
    h_dim = h_ref.shape[-1]

    @pl.when(chunk == 0)
    def _init():
        h_ref[...] = jnp.zeros_like(h_ref)
        c_ref[...] = jnp.zeros_like(c_ref)
        hcd_scr[...] = jnp.zeros_like(hcd_scr)

    # Hoisted input projection for the whole chunk: one (tc*bb, E) x (E, 4H)
    # matmul off the serial path, f32 accumulation + bias fold.
    x_chunk = x_ref[...].reshape(tc * bb, e_in)
    gih_scr[...] = (
        jnp.dot(x_chunk, wih_ref[...], preferred_element_type=jnp.float32)
        + b_ref[...])

    def run_steps(n_steps):
        # Fully-unrolled recurrence with a STATIC trip count (LLO scheduler
        # visibility); h/c stay as values inside the chunk, refs written once.
        h = h_ref[...]            # (bb, H) f32 state
        c = c_ref[...]
        h_cd = hcd_scr[...]       # (bb, H) compute-dtype copy (matmul LHS)
        for t in range(n_steps):
            gates = gih_scr[t * bb:(t + 1) * bb, :] + jnp.dot(
                h_cd, whh_ref[...], preferred_element_type=jnp.float32)
            # PyTorch gate order [i, f, g, o]; lane-aligned slices (H % 128 == 0).
            i_g = jax.nn.sigmoid(gates[:, 0 * h_dim:1 * h_dim])
            f_g = jax.nn.sigmoid(gates[:, 1 * h_dim:2 * h_dim])
            g_g = jnp.tanh(gates[:, 2 * h_dim:3 * h_dim])
            o_g = jax.nn.sigmoid(gates[:, 3 * h_dim:4 * h_dim])
            c = f_g * c + i_g * g_g
            h = o_g * jnp.tanh(c)
            h_cd = h.astype(hcd_scr.dtype)
            out_ref[t] = h_cd.astype(out_ref.dtype)
        h_ref[...] = h
        c_ref[...] = c
        hcd_scr[...] = h_cd

    # Full chunks get the static chunk length; the (single) partial tail chunk
    # gets the static remainder.  Both trip counts are Python constants.
    n_full = seq_len // tc
    rem = seq_len % tc
    if n_full > 0:
        @pl.when(chunk < n_full)
        def _full():
            run_steps(tc)
    if rem > 0:
        @pl.when(chunk == n_full)
        def _partial():
            run_steps(rem)
    # TODO(synk): if bundle dumps show the per-step MXU cost dominated by
    # re-staging W_hh (small bb), evaluate the transposed-state formulation
    # (W_hh @ h^T) or explicit pltpu.matmul_push_rhs weight staging.


def lstm_layer_pallas(x_tbe, w_ih_t, w_hh_t, bias, *, out_dtype,
                      num_cores=1, vmem_budget_bytes=96 * 1024 * 1024,
                      vmem_limit_bytes=100 * 1024 * 1024, time_chunk=None):
    """One LSTM layer over a time-major, padded input.

    x_tbe:  (T, B_pad, E_in)  activations (f32 or bf16)
    w_ih_t: (E_in, 4*H_pad)   input->gate weights (transposed, padded)
    w_hh_t: (H_pad, 4*H_pad)  hidden->gate weights (transposed, padded)
    bias:   (1, 4*H_pad)      b_ih + b_hh (f32)
    Returns (outputs (T, B_pad, H_pad) out_dtype,
             h_T (B_pad, H_pad) f32, c_T (B_pad, H_pad) f32).
    """
    T, B, E = x_tbe.shape
    H = w_hh_t.shape[0]
    compute_dtype = w_ih_t.dtype
    sub = 16 if jnp.dtype(compute_dtype).itemsize < 4 else 8
    assert E % 128 == 0 and H % 128 == 0, "pad feature dims to multiples of 128"
    assert B % sub == 0, "pad batch to a sublane-dense multiple"
    assert w_ih_t.shape == (E, 4 * H) and bias.shape == (1, 4 * H)

    # Megacore: split the batch across TensorCores only on multi-TC chips and
    # only if each core's block stays sublane-dense.
    if num_cores > 1 and B % num_cores == 0 and (B // num_cores) % sub == 0:
        bb = B // num_cores
    else:
        bb = B
    n_bblocks = B // bb

    cap = time_chunk if time_chunk is not None else 32
    tc = _derive_time_chunk(T, bb, E, H, compute_dtype, out_dtype,
                            vmem_budget_bytes, cap)
    n_chunks = pl.cdiv(T, tc)
    grid = (n_bblocks, n_chunks)

    kernel = functools.partial(_lstm_chunk_kernel, seq_len=T)
    return pl.pallas_call(
        kernel,
        out_shape=(
            jax.ShapeDtypeStruct((T, B, H), out_dtype),
            jax.ShapeDtypeStruct((B, H), jnp.float32),
            jax.ShapeDtypeStruct((B, H), jnp.float32),
        ),
        grid_spec=pltpu.PrefetchScalarGridSpec(
            num_scalar_prefetch=0,
            grid=grid,
            in_specs=[
                pl.BlockSpec((tc, bb, E), lambda b, c: (c, b, 0)),
                # Weights/bias: whole-array VMEM residents (single buffered --
                # their contents never change across the grid).
                pl.BlockSpec(memory_space=pltpu.MemorySpace.VMEM),
                pl.BlockSpec(memory_space=pltpu.MemorySpace.VMEM),
                pl.BlockSpec(memory_space=pltpu.MemorySpace.VMEM),
            ],
            out_specs=[
                pl.BlockSpec((tc, bb, H), lambda b, c: (c, b, 0)),
                pl.BlockSpec((bb, H), lambda b, c: (b, 0)),   # resident h state
                pl.BlockSpec((bb, H), lambda b, c: (b, 0)),   # resident c state
            ],
            scratch_shapes=[
                pltpu.VMEM((tc * bb, 4 * H), jnp.float32),    # hoisted gih
                pltpu.VMEM((bb, H), compute_dtype),           # h in compute dtype
            ]),
        compiler_params=pltpu.CompilerParams(
            dimension_semantics=("parallel", "arbitrary"),
            vmem_limit_bytes=int(vmem_limit_bytes),
        ),
    )(x_tbe, w_ih_t, w_hh_t, bias)


# ----------------------------------------------------------------------------
# Parameter init (PyTorch layout) and padded/transposed/cast preparation.
# ----------------------------------------------------------------------------
def init_encoder_params(key, input_dim, emb_dim, hid_dim, n_layers):
    params = {}
    k_emb, key = jax.random.split(key)
    params["embedding"] = jax.random.normal(
        k_emb, (input_dim, emb_dim), jnp.float32)
    scale = 1.0 / float(hid_dim) ** 0.5
    layers = []
    for layer in range(n_layers):
        in_dim = emb_dim if layer == 0 else hid_dim
        k1, k2, k3, k4, key = jax.random.split(key, 5)
        layers.append({
            "w_ih": jax.random.uniform(k1, (4 * hid_dim, in_dim), jnp.float32,
                                       -scale, scale),
            "w_hh": jax.random.uniform(k2, (4 * hid_dim, hid_dim), jnp.float32,
                                       -scale, scale),
            "b_ih": jax.random.uniform(k3, (4 * hid_dim,), jnp.float32,
                                       -scale, scale),
            "b_hh": jax.random.uniform(k4, (4 * hid_dim,), jnp.float32,
                                       -scale, scale),
        })
    params["layers"] = layers
    return params


def prepare_encoder_params(params, emb_dim, hid_dim, n_layers,
                           compute_dtype=jnp.float32, lane=128):
    """Pad emb_dim / hid_dim to multiples of 128, transpose weights to
    (in, 4H) layout, fold the two biases, cast to the compute dtype."""
    h_pad = _round_up(hid_dim, lane)
    e_pad = _round_up(emb_dim, lane)
    emb = jnp.pad(params["embedding"], ((0, 0), (0, e_pad - emb_dim)))
    prepared = {"embedding": emb.astype(compute_dtype), "layers": []}
    for layer in range(n_layers):
        p = params["layers"][layer]
        in_dim = emb_dim if layer == 0 else hid_dim
        in_pad = e_pad if layer == 0 else h_pad

        w_ih = p["w_ih"].reshape(4, hid_dim, in_dim)
        w_ih = jnp.pad(w_ih, ((0, 0), (0, h_pad - hid_dim),
                              (0, in_pad - in_dim)))
        w_hh = p["w_hh"].reshape(4, hid_dim, hid_dim)
        w_hh = jnp.pad(w_hh, ((0, 0), (0, h_pad - hid_dim),
                              (0, h_pad - hid_dim)))
        bias = jnp.pad((p["b_ih"] + p["b_hh"]).reshape(4, hid_dim),
                       ((0, 0), (0, h_pad - hid_dim)))

        prepared["layers"].append({
            "w_ih_t": w_ih.reshape(4 * h_pad, in_pad).T.astype(compute_dtype),
            "w_hh_t": w_hh.reshape(4 * h_pad, h_pad).T.astype(compute_dtype),
            "bias": bias.reshape(1, 4 * h_pad).astype(jnp.float32),
        })
    return prepared


# ----------------------------------------------------------------------------
# Encoder forward: embedding (XLA glue) + stacked Pallas LSTM layers.
# ----------------------------------------------------------------------------
@functools.partial(jax.jit, static_argnames=("hid_dim", "time_chunk"))
def encoder_forward(prepared, src, *, hid_dim, time_chunk=None):
    """src: (B, T) int32 token ids.  Returns (hidden, cell): (n_layers, B, H)."""
    B, T = src.shape
    compute_dtype = prepared["embedding"].dtype

    vmem_cap, num_cores = _tpu_hardware()
    vmem_limit = int(vmem_cap * 0.8)                    # headroom for compiler scratch
    vmem_budget = max(vmem_limit - 6 * 1024 * 1024, vmem_limit // 2)

    # Sublane-dense batch padding; times core count so the multi-TC split is
    # always taken on 2-TC chips.
    sub = 16 if jnp.dtype(compute_dtype).itemsize < 4 else 8
    b_pad = _round_up(max(B, sub), sub * max(1, num_cores))

    embedded = jnp.take(prepared["embedding"], src, axis=0)     # (B, T, E_pad)
    # TODO(synk): nn.Dropout is only active in training; eval-mode identity here.
    x = jnp.transpose(embedded, (1, 0, 2))                      # (T, B, E_pad)
    x = jnp.pad(x, ((0, 0), (0, b_pad - B), (0, 0)))            # pad batch

    hiddens, cells = [], []
    for p in prepared["layers"]:
        x, h_T, c_T = lstm_layer_pallas(
            x, p["w_ih_t"], p["w_hh_t"], p["bias"],
            out_dtype=compute_dtype, num_cores=num_cores,
            vmem_budget_bytes=vmem_budget, vmem_limit_bytes=vmem_limit,
            time_chunk=time_chunk)
        hiddens.append(h_T)
        cells.append(c_T)

    hidden = jnp.stack(hiddens, axis=0)[:, :B, :hid_dim]
    cell = jnp.stack(cells, axis=0)[:, :B, :hid_dim]
    return hidden, cell


# ----------------------------------------------------------------------------
# Pure-JAX reference (lax.scan) for correctness checking.
# ----------------------------------------------------------------------------
def encoder_forward_ref(params, src, hid_dim, n_layers):
    embedded = jnp.take(params["embedding"], src, axis=0)   # (B, T, E)
    x = jnp.transpose(embedded, (1, 0, 2))                  # (T, B, E)
    B = src.shape[0]
    hiddens, cells = [], []
    for layer in range(n_layers):
        p = params["layers"][layer]
        w_ih_t = p["w_ih"].T
        w_hh_t = p["w_hh"].T
        bias = (p["b_ih"] + p["b_hh"])[None, :]

        def step(carry, x_t, w_ih_t=w_ih_t, w_hh_t=w_hh_t, bias=bias):
            h, c = carry
            gates = x_t @ w_ih_t + h @ w_hh_t + bias
            H = hid_dim
            i_g = jax.nn.sigmoid(gates[:, 0 * H:1 * H])
            f_g = jax.nn.sigmoid(gates[:, 1 * H:2 * H])
            g_g = jnp.tanh(gates[:, 2 * H:3 * H])
            o_g = jax.nn.sigmoid(gates[:, 3 * H:4 * H])
            c_new = f_g * c + i_g * g_g
            h_new = o_g * jnp.tanh(c_new)
            return (h_new, c_new), h_new

        init = (jnp.zeros((B, hid_dim), jnp.float32),
                jnp.zeros((B, hid_dim), jnp.float32))
        (h_T, c_T), outs = jax.lax.scan(step, init, x)
        x = outs
        hiddens.append(h_T)
        cells.append(c_T)
    return jnp.stack(hiddens, 0), jnp.stack(cells, 0)


if __name__ == "__main__":
    # Encoder(input_dim, emb_dim, hid_dim, n_layers, dropout), small demo shapes.
    input_dim, emb_dim, hid_dim, n_layers, dropout = 50, 16, 32, 2, 0.1
    batch, seq = 2, 8

    key = jax.random.PRNGKey(0)
    k_params, k_src = jax.random.split(key)
    params = init_encoder_params(k_params, input_dim, emb_dim, hid_dim, n_layers)
    src = jax.random.randint(k_src, (batch, seq), 0, input_dim, dtype=jnp.int32)

    h_want, c_want = encoder_forward_ref(params, src, hid_dim, n_layers)

    # f32, budget-derived chunking (single chunk at this tiny T).
    prep_f32 = prepare_encoder_params(params, emb_dim, hid_dim, n_layers,
                                      compute_dtype=jnp.float32)
    hidden, cell = jax.block_until_ready(
        encoder_forward(prep_f32, src, hid_dim=hid_dim))
    assert hidden.shape == (n_layers, batch, hid_dim)
    assert cell.shape == (n_layers, batch, hid_dim)
    assert jnp.allclose(hidden, h_want, atol=1e-4, rtol=1e-4)
    assert jnp.allclose(cell, c_want, atol=1e-4, rtol=1e-4)

    # f32, forced small chunk (tc=3 -> 2 full chunks + partial tail), exercising
    # the resident h/c carry across grid steps and the static-remainder path.
    hidden3, cell3 = jax.block_until_ready(
        encoder_forward(prep_f32, src, hid_dim=hid_dim, time_chunk=3))
    assert jnp.allclose(hidden3, h_want, atol=1e-4, rtol=1e-4)
    assert jnp.allclose(cell3, c_want, atol=1e-4, rtol=1e-4)

    # bf16 weights/activations (f32 MXU accumulation + f32 gate/state math).
    prep_bf16 = prepare_encoder_params(params, emb_dim, hid_dim, n_layers,
                                       compute_dtype=jnp.bfloat16)
    hidden16, cell16 = jax.block_until_ready(
        encoder_forward(prep_bf16, src, hid_dim=hid_dim, time_chunk=5))
    assert jnp.allclose(hidden16, h_want, atol=1e-1, rtol=1e-1)
    assert jnp.allclose(cell16, c_want, atol=1e-1, rtol=1e-1)

    print("KERNEL_OK")
</pallas_src>

<mosaic_0001>
module attributes {stable_mosaic.version = 11 : i64} {
  func.func @_lstm_chunk_kernel(%arg0: i32, %arg1: i32, %arg2: memref<8x8x128xf32, #tpu.memory_space<vmem>>, %arg3: memref<128x512xf32, #tpu.memory_space<vmem>>, %arg4: memref<128x512xf32, #tpu.memory_space<vmem>>, %arg5: memref<1x512xf32, #tpu.memory_space<vmem>>, %arg6: memref<8x8x128xf32, #tpu.memory_space<vmem>>, %arg7: memref<8x128xf32, #tpu.memory_space<vmem>>, %arg8: memref<8x128xf32, #tpu.memory_space<vmem>>, %arg9: memref<64x512xf32, #tpu.memory_space<vmem>>, %arg10: memref<8x128xf32, #tpu.memory_space<vmem>>) attributes {dimension_semantics = [#tpu.dimension_semantics<parallel>, #tpu.dimension_semantics<arbitrary>], iteration_bounds = array<i64: 1, 1>, scalar_prefetch = 0 : i64, scratch_operands = 2 : i64, tpu.core_type = #tpu.core_type<tc>, window_params = [{transform_indices = @transform_0, window_bounds = array<i64: 8, 8, 128>}, {pipeline_mode = #tpu.pipeline_mode<synchronous>, transform_indices = @transform_1, window_bounds = array<i64: 128, 512>}, {pipeline_mode = #tpu.pipeline_mode<synchronous>, transform_indices = @transform_2, window_bounds = array<i64: 128, 512>}, {pipeline_mode = #tpu.pipeline_mode<synchronous>, transform_indices = @transform_3, window_bounds = array<i64: 1, 512>}, {transform_indices = @transform_4, window_bounds = array<i64: 8, 8, 128>}, {transform_indices = @transform_5, window_bounds = array<i64: 8, 128>}, {transform_indices = @transform_6, window_bounds = array<i64: 8, 128>}]} {
    %c0_i32 = arith.constant 0 : i32
    %0 = arith.cmpi eq, %arg1, %c0_i32 : i32
    %1 = arith.extui %0 : i1 to i32
    %c0_i32_0 = arith.constant 0 : i32
    %2 = arith.cmpi ne, %1, %c0_i32_0 : i32
    scf.if %2 {
      %cst_10 = arith.constant 0.000000e+00 : f32
      %14 = vector.broadcast %cst_10 : f32 to vector<8x128xf32>
      %c0_11 = arith.constant 0 : index
      %c0_12 = arith.constant 0 : index
      %15 = vector.load %arg7[%c0_11, %c0_12] : memref<8x128xf32, #tpu.memory_space<vmem>>, vector<8x128xf32>
      tpu.vector_store %arg7[%c0_11, %c0_12], %14 {strides = array<i32>} : memref<8x128xf32, #tpu.memory_space<vmem>>, vector<8x128xf32>,
      %cst_13 = arith.constant 0.000000e+00 : f32
      %16 = vector.broadcast %cst_13 : f32 to vector<8x128xf32>
      %c0_14 = arith.constant 0 : index
      %c0_15 = arith.constant 0 : index
      %17 = vector.load %arg8[%c0_14, %c0_15] : memref<8x128xf32, #tpu.memory_space<vmem>>, vector<8x128xf32>
      tpu.vector_store %arg8[%c0_14, %c0_15], %16 {strides = array<i32>} : memref<8x128xf32, #tpu.memory_space<vmem>>, vector<8x128xf32>,
      %cst_16 = arith.constant 0.000000e+00 : f32
      %18 = vector.broadcast %cst_16 : f32 to vector<8x128xf32>
      %c0_17 = arith.constant 0 : index
      %c0_18 = arith.constant 0 : index
      %19 = vector.load %arg10[%c0_17, %c0_18] : memref<8x128xf32, #tpu.memory_space<vmem>>, vector<8x128xf32>
      tpu.vector_store %arg10[%c0_17, %c0_18], %18 {strides = array<i32>} : memref<8x128xf32, #tpu.memory_space<vmem>>, vector<8x128xf32>,
    } else {
    }
    %c0 = arith.constant 0 : index
    %c0_1 = arith.constant 0 : index
    %c0_2 = arith.constant 0 : index
    %3 = vector.load %arg2[%c0, %c0_1, %c0_2] : memref<8x8x128xf32, #tpu.memory_space<vmem>>, vector<8x8x128xf32>
    %4 = vector.shape_cast %3 : vector<8x8x128xf32> to vector<64x128xf32>
    %c0_3 = arith.constant 0 : index
    %c0_4 = arith.constant 0 : index
    %5 = vector.load %arg3[%c0_3, %c0_4] : memref<128x512xf32, #tpu.memory_space<vmem>>, vector<128x512xf32>
    %cst = arith.constant dense<0.000000e+00> : vector<64x512xf32>
    %6 = tpu.matmul %4, %5, %cst {dimension_numbers = #tpu.dot_dimension_numbers<[1], [0], [0], [1], [0, 0, 1, 1], [], []>} : vector<64x128xf32>, vector<128x512xf32>, vector<64x512xf32> -> vector<64x512xf32>
    %c0_5 = arith.constant 0 : index
    %c0_6 = arith.constant 0 : index
    %7 = vector.load %arg5[%c0_5, %c0_6] : memref<1x512xf32, #tpu.memory_space<vmem>>, vector<1x512xf32>
    %8 = vector.broadcast %7 : vector<1x512xf32> to vector<64x512xf32>
    %9 = arith.addf %6, %8 : vector<64x512xf32>
    %c0_7 = arith.constant 0 : index
    %c0_8 = arith.constant 0 : index
    %10 = vector.load %arg9[%c0_7, %c0_8] : memref<64x512xf32, #tpu.memory_space<vmem>>, vector<64x512xf32>
    tpu.vector_store %arg9[%c0_7, %c0_8], %9 {strides = array<i32>} : memref<64x512xf32, #tpu.memory_space<vmem>>, vector<64x512xf32>,
    %c1_i32 = arith.constant 1 : i32
    %11 = arith.cmpi slt, %arg1, %c1_i32 : i32
    %12 = arith.extui %11 : i1 to i32
    %c0_i32_9 = arith.constant 0 : i32
    %13 = arith.cmpi ne, %12, %c0_i32_9 : i32
    scf.if %13 {
      %c0_10 = arith.constant 0 : index
      %c0_11 = arith.constant 0 : index
      %14 = vector.load %arg8[%c0_10, %c0_11] : memref<8x128xf32, #tpu.memory_space<vmem>>, vector<8x128xf32>
      %c0_12 = arith.constant 0 : index
      %c0_13 = arith.constant 0 : index
      %15 = vector.load %arg10[%c0_12, %c0_13] : memref<8x128xf32, #tpu.memory_space<vmem>>, vector<8x128xf32>
      %c0_14 = arith.constant 0 : index
      %c0_15 = arith.constant 0 : index
      %16 = vector.load %arg9[%c0_14, %c0_15] : memref<64x512xf32, #tpu.memory_space<vmem>>, vector<8x512xf32>
      %c0_16 = arith.constant 0 : index
      %c0_17 = arith.constant 0 : index
      %17 = vector.load %arg4[%c0_16, %c0_17] : memref<128x512xf32, #tpu.memory_space<vmem>>, vector<128x512xf32>
      %cst_18 = arith.constant dense<0.000000e+00> : vector<8x512xf32>
      %18 = tpu.matmul %15, %17, %cst_18 {dimension_numbers = #tpu.dot_dimension_numbers<[1], [0], [0], [1], [0, 0, 1, 1], [], []>} : vector<8x128xf32>, vector<128x512xf32>, vector<8x512xf32> -> vector<8x512xf32>
      %19 = arith.addf %16, %18 : vector<8x512xf32>
      %20 = vector.extract_strided_slice %19 {offsets = [0, 0], sizes = [8, 128], strides = [1, 1]} : vector<8x512xf32> to vector<8x128xf32>
      %21 = arith.negf %20 : vector<8x128xf32>
      %22 = math.exp %21 : vector<8x128xf32>
      %cst_19 = arith.constant 1.000000e+00 : f32
      %23 = vector.broadcast %cst_19 : f32 to vector<8x128xf32>
      %24 = arith.addf %23, %22 : vector<8x128xf32>
      %25 = arith.divf %23, %24 : vector<8x128xf32>
      %26 = vector.extract_strided_slice %19 {offsets = [0, 128], sizes = [8, 128], strides = [1, 1]} : vector<8x512xf32> to vector<8x128xf32>
      %27 = arith.negf %26 : vector<8x128xf32>
      %28 = math.exp %27 : vector<8x128xf32>
      %cst_20 = arith.constant 1.000000e+00 : f32
      %29 = vector.broadcast %cst_20 : f32 to vector<8x128xf32>
      %30 = arith.addf %29, %28 : vector<8x128xf32>
      %31 = arith.divf %29, %30 : vector<8x128xf32>
      %32 = vector.extract_strided_slice %19 {offsets = [0, 256], sizes = [8, 128], strides = [1, 1]} : vector<8x512xf32> to vector<8x128xf32>
      %33 = math.tanh %32 : vector<8x128xf32>
      %34 = vector.extract_strided_slice %19 {offsets = [0, 384], sizes = [8, 128], strides = [1, 1]} : vector<8x512xf32> to vector<8x128xf32>
      %35 = arith.negf %34 : vector<8x128xf32>
      %36 = math.exp %35 : vector<8x128xf32>
      %cst_21 = arith.constant 1.000000e+00 : f32
      %37 = vector.broadcast %cst_21 : f32 to vector<8x128xf32>
      %38 = arith.addf %37, %36 : vector<8x128xf32>
      %39 = arith.divf %37, %38 : vector<8x128xf32>
      %40 = arith.mulf %31, %14 : vector<8x128xf32>
      %41 = arith.mulf %25, %33 : vector<8x128xf32>
      %42 = arith.addf %40, %41 : vector<8x128xf32>
      %43 = math.tanh %42 : vector<8x128xf32>
      %44 = arith.mulf %39, %43 : vector<8x128xf32>
      %c0_22 = arith.constant 0 : index
      %c0_23 = arith.constant 0 : index
      %c0_24 = arith.constant 0 : index
      %45 = vector.load %arg6[%c0_22, %c0_23, %c0_24] : memref<8x8x128xf32, #tpu.memory_space<vmem>>, vector<1x8x128xf32>
      %46 = vector.shape_cast %45 : vector<1x8x128xf32> to vector<8x128xf32>
      %47 = vector.shape_cast %44 : vector<8x128xf32> to vector<1x8x128xf32>
      tpu.vector_store %arg6[%c0_22, %c0_23, %c0_24], %47 {strides = array<i32>} : memref<8x8x128xf32, #tpu.memory_space<vmem>>, vector<1x8x128xf32>,
      %c8 = arith.constant 8 : index
      %c0_25 = arith.constant 0 : index
      %48 = vector.load %arg9[%c8, %c0_25] : memref<64x512xf32, #tpu.memory_space<vmem>>, vector<8x512xf32>
      %c0_26 = arith.constant 0 : index
      %c0_27 = arith.constant 0 : index
      %49 = vector.load %arg4[%c0_26, %c0_27] : memref<128x512xf32, #tpu.memory_space<vmem>>, vector<128x512xf32>
      %cst_28 = arith.constant dense<0.000000e+00> : vector<8x512xf32>
      %50 = tpu.matmul %44, %49, %cst_28 {dimension_numbers = #tpu.dot_dimension_numbers<[1], [0], [0], [1], [0, 0, 1, 1], [], []>} : vector<8x128xf32>, vector<128x512xf32>, vector<8x512xf32> -> vector<8x512xf32>
      %51 = arith.addf %48, %50 : vector<8x512xf32>
      %52 = vector.extract_strided_slice %51 {offsets = [0, 0], sizes = [8, 128], strides = [1, 1]} : vector<8x512xf32> to vector<8x128xf32>
      %53 = arith.negf %52 : vector<8x128xf32>
      %54 = math.exp %53 : vector<8x128xf32>
      %cst_29 = arith.constant 1.000000e+00 : f32
      %55 = vector.broadcast %cst_29 : f32 to vector<8x128xf32>
      %56 = arith.addf %55, %54 : vector<8x128xf32>
      %57 = arith.divf %55, %56 : vector<8x128xf32>
      %58 = vector.extract_strided_slice %51 {offsets = [0, 128], sizes = [8, 128], strides = [1, 1]} : vector<8x512xf32> to vector<8x128xf32>
      %59 = arith.negf %58 : vector<8x128xf32>
      %60 = math.exp %59 : vector<8x128xf32>
      %cst_30 = arith.constant 1.000000e+00 : f32
      %61 = vector.broadcast %cst_30 : f32 to vector<8x128xf32>
      %62 = arith.addf %61, %60 : vector<8x128xf32>
      %63 = arith.divf %61, %62 : vector<8x128xf32>
      %64 = vector.extract_strided_slice %51 {offsets = [0, 256], sizes = [8, 128], strides = [1, 1]} : vector<8x512xf32> to vector<8x128xf32>
      %65 = math.tanh %64 : vector<8x128xf32>
      %66 = vector.extract_strided_slice %51 {offsets = [0, 384], sizes = [8, 128], strides = [1, 1]} : vector<8x512xf32> to vector<8x128xf32>
      %67 = arith.negf %66 : vector<8x128xf32>
      %68 = math.exp %67 : vector<8x128xf32>
      %cst_31 = arith.constant 1.000000e+00 : f32
      %69 = vector.broadcast %cst_31 : f32 to vector<8x128xf32>
      %70 = arith.addf %69, %68 : vector<8x128xf32>
      %71 = arith.divf %69, %70 : vector<8x128xf32>
      %72 = arith.mulf %63, %42 : vector<8x128xf32>
      %73 = arith.mulf %57, %65 : vector<8x128xf32>
      %74 = arith.addf %72, %73 : vector<8x128xf32>
      %75 = math.tanh %74 : vector<8x128xf32>
      %76 = arith.mulf %71, %75 : vector<8x128xf32>
      %c1 = arith.constant 1 : index
      %c0_32 = arith.constant 0 : index
      %c0_33 = arith.constant 0 : index
      %77 = vector.load %arg6[%c1, %c0_32, %c0_33] : memref<8x8x128xf32, #tpu.memory_space<vmem>>, vector<1x8x128xf32>
      %78 = vector.shape_cast %77 : vector<1x8x128xf32> to vector<8x128xf32>
      %79 = vector.shape_cast %76 : vector<8x128xf32> to vector<1x8x128xf32>
      tpu.vector_store %arg6[%c1, %c0_32, %c0_33], %79 {strides = array<i32>} : memref<8x8x128xf32, #tpu.memory_space<vmem>>, vector<1x8x128xf32>,
      %c16 = arith.constant 16 : index
      %c0_34 = arith.constant 0 : index
      %80 = vector.load %arg9[%c16, %c0_34] : memref<64x512xf32, #tpu.memory_space<vmem>>, vector<8x512xf32>
      %c0_35 = arith.constant 0 : index
      %c0_36 = arith.constant 0 : index
      %81 = vector.load %arg4[%c0_35, %c0_36] : memref<128x512xf32, #tpu.memory_space<vmem>>, vector<128x512xf32>
      %cst_37 = arith.constant dense<0.000000e+00> : vector<8x512xf32>
      %82 = tpu.matmul %76, %81, %cst_37 {dimension_numbers = #tpu.dot_dimension_numbers<[1], [0], [0], [1], [0, 0, 1, 1], [], []>} : vector<8x128xf32>, vector<128x512xf32>, vector<8x512xf32> -> vector<8x512xf32>
      %83 = arith.addf %80, %82 : vector<8x512xf32>
      %84 = vector.extract_strided_slice %83 {offsets = [0, 0], sizes = [8, 128], strides = [1, 1]} : vector<8x512xf32> to vector<8x128xf32>
      %85 = arith.negf %84 : vector<8x128xf32>
      %86 = math.exp %85 : vector<8x128xf32>
      %cst_38 = arith.constant 1.000000e+00 : f32
      %87 = vector.broadcast %cst_38 : f32 to vector<8x128xf32>
      %88 = arith.addf %87, %86 : vector<8x128xf32>
      %89 = arith.divf %87, %88 : vector<8x128xf32>
      %90 = vector.extract_strided_slice %83 {offsets = [0, 128], sizes = [8, 128], strides = [1, 1]} : vector<8x512xf32> to vector<8x128xf32>
      %91 = arith.negf %90 : vector<8x128xf32>
      %92 = math.exp %91 : vector<8x128xf32>
      %cst_39 = arith.constant 1.000000e+00 : f32
      %93 = vector.broadcast %cst_39 : f32 to vector<8x128xf32>
      %94 = arith.addf %93, %92 : vector<8x128xf32>
      %95 = arith.divf %93, %94 : vector<8x128xf32>
      %96 = vector.extract_strided_slice %83 {offsets = [0, 256], sizes = [8, 128], strides = [1, 1]} : vector<8x512xf32> to vector<8x128xf32>
      %97 = math.tanh %96 : vector<8x128xf32>
      %98 = vector.extract_strided_slice %83 {offsets = [0, 384], sizes = [8, 128], strides = [1, 1]} : vector<8x512xf32> to vector<8x128xf32>
      %99 = arith.negf %98 : vector<8x128xf32>
      %100 = math.exp %99 : vector<8x128xf32>
      %cst_40 = arith.constant 1.000000e+00 : f32
      %101 = vector.broadcast %cst_40 : f32 to vector<8x128xf32>
      %102 = arith.addf %101, %100 : vector<8x128xf32>
      %103 = arith.divf %101, %102 : vector<8x128xf32>
      %104 = arith.mulf %95, %74 : vector<8x128xf32>
      %105 = arith.mulf %89, %97 : vector<8x128xf32>
      %106 = arith.addf %104, %105 : vector<8x128xf32>
      %107 = math.tanh %106 : vector<8x128xf32>
      %108 = arith.mulf %103, %107 : vector<8x128xf32>
      %c2 = arith.constant 2 : index
      %c0_41 = arith.constant 0 : index
      %c0_42 = arith.constant 0 : index
      %109 = vector.load %arg6[%c2, %c0_41, %c0_42] : memref<8x8x128xf32, #tpu.memory_space<vmem>>, vector<1x8x128xf32>
      %110 = vector.shape_cast %109 : vector<1x8x128xf32> to vector<8x128xf32>
      %111 = vector.shape_cast %108 : vector<8x128xf32> to vector<1x8x128xf32>
      tpu.vector_store %arg6[%c2, %c0_41, %c0_42], %111 {strides = array<i32>} : memref<8x8x128xf32, #tpu.memory_space<vmem>>, vector<1x8x128xf32>,
      %c24 = arith.constant 24 : index
      %c0_43 = arith.constant 0 : index
      %112 = vector.load %arg9[%c24, %c0_43] : memref<64x512xf32, #tpu.memory_space<vmem>>, vector<8x512xf32>
      %c0_44 = arith.constant 0 : index
      %c0_45 = arith.constant 0 : index
      %113 = vector.load %arg4[%c0_44, %c0_45] : memref<128x512xf32, #tpu.memory_space<vmem>>, vector<128x512xf32>
      %cst_46 = arith.constant dense<0.000000e+00> : vector<8x512xf32>
      %114 = tpu.matmul %108, %113, %cst_46 {dimension_numbers = #tpu.dot_dimension_numbers<[1], [0], [0], [1], [0, 0, 1, 1], [], []>} : vector<8x128xf32>, vector<128x512xf32>, vector<8x512xf32> -> vector<8x512xf32>
      %115 = arith.addf %112, %114 : vector<8x512xf32>
      %116 = vector.extract_strided_slice %115 {offsets = [0, 0], sizes = [8, 128], strides = [1, 1]} : vector<8x512xf32> to vector<8x128xf32>
      %117 = arith.negf %116 : vector<8x128xf32>
      %118 = math.exp %117 : vector<8x128xf32>
      %cst_47 = arith.constant 1.000000e+00 : f32
      %119 = vector.broadcast %cst_47 : f32 to vector<8x128xf32>
      %120 = arith.addf %119, %118 : vector<8x128xf32>
      %121 = arith.divf %119, %120 : vector<8x128xf32>
      %122 = vector.extract_strided_slice %115 {offsets = [0, 128], sizes = [8, 128], strides = [1, 1]} : vector<8x512xf32> to vector<8x128xf32>
      %123 = arith.negf %122 : vector<8x128xf32>
      %124 = math.exp %123 : vector<8x128xf32>
      %cst_48 = arith.constant 1.000000e+00 : f32
      %125 = vector.broadcast %cst_48 : f32 to vector<8x128xf32>
      %126 = arith.addf %125, %124 : vector<8x128xf32>
      %127 = arith.divf %125, %126 : vector<8x128xf32>
      %128 = vector.extract_strided_slice %115 {offsets = [0, 256], sizes = [8, 128], strides = [1, 1]} : vector<8x512xf32> to vector<8x128xf32>
      %129 = math.tanh %128 : vector<8x128xf32>
      %130 = vector.extract_strided_slice %115 {offsets = [0, 384], sizes = [8, 128], strides = [1, 1]} : vector<8x512xf32> to vector<8x128xf32>
      %131 = arith.negf %130 : vector<8x128xf32>
      %132 = math.exp %131 : vector<8x128xf32>
      %cst_49 = arith.constant 1.000000e+00 : f32
      %133 = vector.broadcast %cst_49 : f32 to vector<8x128xf32>
      %134 = arith.addf %133, %132 : vector<8x128xf32>
      %135 = arith.divf %133, %134 : vector<8x128xf32>
      %136 = arith.mulf %127, %106 : vector<8x128xf32>
      %137 = arith.mulf %121, %129 : vector<8x128xf32>
      %138 = arith.addf %136, %137 : vector<8x128xf32>
      %139 = math.tanh %138 : vector<8x128xf32>
      %140 = arith.mulf %135, %139 : vector<8x128xf32>
      %c3 = arith.constant 3 : index
      %c0_50 = arith.constant 0 : index
      %c0_51 = arith.constant 0 : index
      %141 = vector.load %arg6[%c3, %c0_50, %c0_51] : memref<8x8x128xf32, #tpu.memory_space<vmem>>, vector<1x8x128xf32>
      %142 = vector.shape_cast %141 : vector<1x8x128xf32> to vector<8x128xf32>
      %143 = vector.shape_cast %140 : vector<8x128xf32> to vector<1x8x128xf32>
      tpu.vector_store %arg6[%c3, %c0_50, %c0_51], %143 {strides = array<i32>} : memref<8x8x128xf32, #tpu.memory_space<vmem>>, vector<1x8x128xf32>,
      %c32 = arith.constant 32 : index
      %c0_52 = arith.constant 0 : index
      %144 = vector.load %arg9[%c32, %c0_52] : memref<64x512xf32, #tpu.memory_space<vmem>>, vector<8x512xf32>
      %c0_53 = arith.constant 0 : index
      %c0_54 = arith.constant 0 : index
      %145 = vector.load %arg4[%c0_53, %c0_54] : memref<128x512xf32, #tpu.memory_space<vmem>>, vector<128x512xf32>
      %cst_55 = arith.constant dense<0.000000e+00> : vector<8x512xf32>
      %146 = tpu.matmul %140, %145, %cst_55 {dimension_numbers = #tpu.dot_dimension_numbers<[1], [0], [0], [1], [0, 0, 1, 1], [], []>} : vector<8x128xf32>, vector<128x512xf32>, vector<8x512xf32> -> vector<8x512xf32>
      %147 = arith.addf %144, %146 : vector<8x512xf32>
      %148 = vector.extract_strided_slice %147 {offsets = [0, 0], sizes = [8, 128], strides = [1, 1]} : vector<8x512xf32> to vector<8x128xf32>
      %149 = arith.negf %148 : vector<8x128xf32>
      %150 = math.exp %149 : vector<8x128xf32>
      %cst_56 = arith.constant 1.000000e+00 : f32
      %151 = vector.broadcast %cst_56 : f32 to vector<8x128xf32>
      %152 = arith.addf %151, %150 : vector<8x128xf32>
      %153 = arith.divf %151, %152 : vector<8x128xf32>
      %154 = vector.extract_strided_slice %147 {offsets = [0, 128], sizes = [8, 128], strides = [1, 1]} : vector<8x512xf32> to vector<8x128xf32>
      %155 = arith.negf %154 : vector<8x128xf32>
      %156 = math.exp %155 : vector<8x128xf32>
      %cst_57 = arith.constant 1.000000e+00 : f32
      %157 = vector.broadcast %cst_57 : f32 to vector<8x128xf32>
      %158 = arith.addf %157, %156 : vector<8x128xf32>
      %159 = arith.divf %157, %158 : vector<8x128xf32>
      %160 = vector.extract_strided_slice %147 {offsets = [0, 256], sizes = [8, 128], strides = [1, 1]} : vector<8x512xf32> to vector<8x128xf32>
      %161 = math.tanh %160 : vector<8x128xf32>
      %162 = vector.extract_strided_slice %147 {offsets = [0, 384], sizes = [8, 128], strides = [1, 1]} : vector<8x512xf32> to vector<8x128xf32>
      %163 = arith.negf %162 : vector<8x128xf32>
      %164 = math.exp %163 : vector<8x128xf32>
      %cst_58 = arith.constant 1.000000e+00 : f32
      %165 = vector.broadcast %cst_58 : f32 to vector<8x128xf32>
      %166 = arith.addf %165, %164 : vector<8x128xf32>
      %167 = arith.divf %165, %166 : vector<8x128xf32>
      %168 = arith.mulf %159, %138 : vector<8x128xf32>
      %169 = arith.mulf %153, %161 : vector<8x128xf32>
      %170 = arith.addf %168, %169 : vector<8x128xf32>
      %171 = math.tanh %170 : vector<8x128xf32>
      %172 = arith.mulf %167, %171 : vector<8x128xf32>
      %c4 = arith.constant 4 : index
      %c0_59 = arith.constant 0 : index
      %c0_60 = arith.constant 0 : index
      %173 = vector.load %arg6[%c4, %c0_59, %c0_60] : memref<8x8x128xf32, #tpu.memory_space<vmem>>, vector<1x8x128xf32>
      %174 = vector.shape_cast %173 : vector<1x8x128xf32> to vector<8x128xf32>
      %175 = vector.shape_cast %172 : vector<8x128xf32> to vector<1x8x128xf32>
      tpu.vector_store %arg6[%c4, %c0_59, %c0_60], %175 {strides = array<i32>} : memref<8x8x128xf32, #tpu.memory_space<vmem>>, vector<1x8x128xf32>,
      %c40 = arith.constant 40 : index
      %c0_61 = arith.constant 0 : index
      %176 = vector.load %arg9[%c40, %c0_61] : memref<64x512xf32, #tpu.memory_space<vmem>>, vector<8x512xf32>
      %c0_62 = arith.constant 0 : index
      %c0_63 = arith.constant 0 : index
      %177 = vector.load %arg4[%c0_62, %c0_63] : memref<128x512xf32, #tpu.memory_space<vmem>>, vector<128x512xf32>
      %cst_64 = arith.constant dense<0.000000e+00> : vector<8x512xf32>
      %178 = tpu.matmul %172, %177, %cst_64 {dimension_numbers = #tpu.dot_dimension_numbers<[1], [0], [0], [1], [0, 0, 1, 1], [], []>} : vector<8x128xf32>, vector<128x512xf32>, vector<8x512xf32> -> vector<8x512xf32>
      %179 = arith.addf %176, %178 : vector<8x512xf32>
      %180 = vector.extract_strided_slice %179 {offsets = [0, 0], sizes = [8, 128], strides = [1, 1]} : vector<8x512xf32> to vector<8x128xf32>
      %181 = arith.negf %180 : vector<8x128xf32>
      %182 = math.exp %181 : vector<8x128xf32>
      %cst_65 = arith.constant 1.000000e+00 : f32
      %183 = vector.broadcast %cst_65 : f32 to vector<8x128xf32>
      %184 = arith.addf %183, %182 : vector<8x128xf32>
      %185 = arith.divf %183, %184 : vector<8x128xf32>
      %186 = vector.extract_strided_slice %179 {offsets = [0, 128], sizes = [8, 128], strides = [1, 1]} : vector<8x512xf32> to vector<8x128xf32>
      %187 = arith.negf %186 : vector<8x128xf32>
      %188 = math.exp %187 : vector<8x128xf32>
      %cst_66 = arith.constant 1.000000e+00 : f32
      %189 = vector.broadcast %cst_66 : f32 to vector<8x128xf32>
      %190 = arith.addf %189, %188 : vector<8x128xf32>
      %191 = arith.divf %189, %190 : vector<8x128xf32>
      %192 = vector.extract_strided_slice %179 {offsets = [0, 256], sizes = [8, 128], strides = [1, 1]} : vector<8x512xf32> to vector<8x128xf32>
      %193 = math.tanh %192 : vector<8x128xf32>
      %194 = vector.extract_strided_slice %179 {offsets = [0, 384], sizes = [8, 128], strides = [1, 1]} : vector<8x512xf32> to vector<8x128xf32>
      %195 = arith.negf %194 : vector<8x128xf32>
      %196 = math.exp %195 : vector<8x128xf32>
      %cst_67 = arith.constant 1.000000e+00 : f32
      %197 = vector.broadcast %cst_67 : f32 to vector<8x128xf32>
      %198 = arith.addf %197, %196 : vector<8x128xf32>
      %199 = arith.divf %197, %198 : vector<8x128xf32>
      %200 = arith.mulf %191, %170 : vector<8x128xf32>
      %201 = arith.mulf %185, %193 : vector<8x128xf32>
      %202 = arith.addf %200, %201 : vector<8x128xf32>
      %203 = math.tanh %202 : vector<8x128xf32>
      %204 = arith.mulf %199, %203 : vector<8x128xf32>
      %c5 = arith.constant 5 : index
      %c0_68 = arith.constant 0 : index
      %c0_69 = arith.constant 0 : index
      %205 = vector.load %arg6[%c5, %c0_68, %c0_69] : memref<8x8x128xf32, #tpu.memory_space<vmem>>, vector<1x8x128xf32>
      %206 = vector.shape_cast %205 : vector<1x8x128xf32> to vector<8x128xf32>
      %207 = vector.shape_cast %204 : vector<8x128xf32> to vector<1x8x128xf32>
      tpu.vector_store %arg6[%c5, %c0_68, %c0_69], %207 {strides = array<i32>} : memref<8x8x128xf32, #tpu.memory_space<vmem>>, vector<1x8x128xf32>,
      %c48 = arith.constant 48 : index
      %c0_70 = arith.constant 0 : index
      %208 = vector.load %arg9[%c48, %c0_70] : memref<64x512xf32, #tpu.memory_space<vmem>>, vector<8x512xf32>
      %c0_71 = arith.constant 0 : index
      %c0_72 = arith.constant 0 : index
      %209 = vector.load %arg4[%c0_71, %c0_72] : memref<128x512xf32, #tpu.memory_space<vmem>>, vector<128x512xf32>
      %cst_73 = arith.constant dense<0.000000e+00> : vector<8x512xf32>
      %210 = tpu.matmul %204, %209, %cst_73 {dimension_numbers = #tpu.dot_dimension_numbers<[1], [0], [0], [1], [0, 0, 1, 1], [], []>} : vector<8x128xf32>, vector<128x512xf32>, vector<8x512xf32> -> vector<8x512xf32>
      %211 = arith.addf %208, %210 : vector<8x512xf32>
      %212 = vector.extract_strided_slice %211 {offsets = [0, 0], sizes = [8, 128], strides = [1, 1]} : vector<8x512xf32> to vector<8x128xf32>
      %213 = arith.negf %212 : vector<8x128xf32>
      %214 = math.exp %213 : vector<8x128xf32>
      %cst_74 = arith.constant 1.000000e+00 : f32
      %215 = vector.broadcast %cst_74 : f32 to vector<8x128xf32>
      %216 = arith.addf %215, %214 : vector<8x128xf32>
      %217 = arith.divf %215, %216 : vector<8x128xf32>
      %218 = vector.extract_strided_slice %211 {offsets = [0, 128], sizes = [8, 128], strides = [1, 1]} : vector<8x512xf32> to vector<8x128xf32>
      %219 = arith.negf %218 : vector<8x128xf32>
      %220 = math.exp %219 : vector<8x128xf32>
      %cst_75 = arith.constant 1.000000e+00 : f32
      %221 = vector.broadcast %cst_75 : f32 to vector<8x128xf32>
      %222 = arith.addf %221, %220 : vector<8x128xf32>
      %223 = arith.divf %221, %222 : vector<8x128xf32>
      %224 = vector.extract_strided_slice %211 {offsets = [0, 256], sizes = [8, 128], strides = [1, 1]} : vector<8x512xf32> to vector<8x128xf32>
      %225 = math.tanh %224 : vector<8x128xf32>
      %226 = vector.extract_strided_slice %211 {offsets = [0, 384], sizes = [8, 128], strides = [1, 1]} : vector<8x512xf32> to vector<8x128xf32>
      %227 = arith.negf %226 : vector<8x128xf32>
      %228 = math.exp %227 : vector<8x128xf32>
      %cst_76 = arith.constant 1.000000e+00 : f32
      %229 = vector.broadcast %cst_76 : f32 to vector<8x128xf32>
      %230 = arith.addf %229, %228 : vector<8x128xf32>
      %231 = arith.divf %229, %230 : vector<8x128xf32>
      %232 = arith.mulf %223, %202 : vector<8x128xf32>
      %233 = arith.mulf %217, %225 : vector<8x128xf32>
      %234 = arith.addf %232, %233 : vector<8x128xf32>
      %235 = math.tanh %234 : vector<8x128xf32>
      %236 = arith.mulf %231, %235 : vector<8x128xf32>
      %c6 = arith.constant 6 : index
      %c0_77 = arith.constant 0 : index
      %c0_78 = arith.constant 0 : index
      %237 = vector.load %arg6[%c6, %c0_77, %c0_78] : memref<8x8x128xf32, #tpu.memory_space<vmem>>, vector<1x8x128xf32>
      %238 = vector.shape_cast %237 : vector<1x8x128xf32> to vector<8x128xf32>
      %239 = vector.shape_cast %236 : vector<8x128xf32> to vector<1x8x128xf32>
      tpu.vector_store %arg6[%c6, %c0_77, %c0_78], %239 {strides = array<i32>} : memref<8x8x128xf32, #tpu.memory_space<vmem>>, vector<1x8x128xf32>,
      %c56 = arith.constant 56 : index
      %c0_79 = arith.constant 0 : index
      %240 = vector.load %arg9[%c56, %c0_79] : memref<64x512xf32, #tpu.memory_space<vmem>>, vector<8x512xf32>
      %c0_80 = arith.constant 0 : index
      %c0_81 = arith.constant 0 : index
      %241 = vector.load %arg4[%c0_80, %c0_81] : memref<128x512xf32, #tpu.memory_space<vmem>>, vector<128x512xf32>
      %cst_82 = arith.constant dense<0.000000e+00> : vector<8x512xf32>
      %242 = tpu.matmul %236, %241, %cst_82 {dimension_numbers = #tpu.dot_dimension_numbers<[1], [0], [0], [1], [0, 0, 1, 1], [], []>} : vector<8x128xf32>, vector<128x512xf32>, vector<8x512xf32> -> vector<8x512xf32>
      %243 = arith.addf %240, %242 : vector<8x512xf32>
      %244 = vector.extract_strided_slice %243 {offsets = [0, 0], sizes = [8, 128], strides = [1, 1]} : vector<8x512xf32> to vector<8x128xf32>
      %245 = arith.negf %244 : vector<8x128xf32>
      %246 = math.exp %245 : vector<8x128xf32>
      %cst_83 = arith.constant 1.000000e+00 : f32
      %247 = vector.broadcast %cst_83 : f32 to vector<8x128xf32>
      %248 = arith.addf %247, %246 : vector<8x128xf32>
      %249 = arith.divf %247, %248 : vector<8x128xf32>
      %250 = vector.extract_strided_slice %243 {offsets = [0, 128], sizes = [8, 128], strides = [1, 1]} : vector<8x512xf32> to vector<8x128xf32>
      %251 = arith.negf %250 : vector<8x128xf32>
      %252 = math.exp %251 : vector<8x128xf32>
      %cst_84 = arith.constant 1.000000e+00 : f32
      %253 = vector.broadcast %cst_84 : f32 to vector<8x128xf32>
      %254 = arith.addf %253, %252 : vector<8x128xf32>
      %255 = arith.divf %253, %254 : vector<8x128xf32>
      %256 = vector.extract_strided_slice %243 {offsets = [0, 256], sizes = [8, 128], strides = [1, 1]} : vector<8x512xf32> to vector<8x128xf32>
      %257 = math.tanh %256 : vector<8x128xf32>
      %258 = vector.extract_strided_slice %243 {offsets = [0, 384], sizes = [8, 128], strides = [1, 1]} : vector<8x512xf32> to vector<8x128xf32>
      %259 = arith.negf %258 : vector<8x128xf32>
      %260 = math.exp %259 : vector<8x128xf32>
      %cst_85 = arith.constant 1.000000e+00 : f32
      %261 = vector.broadcast %cst_85 : f32 to vector<8x128xf32>
      %262 = arith.addf %261, %260 : vector<8x128xf32>
      %263 = arith.divf %261, %262 : vector<8x128xf32>
      %264 = arith.mulf %255, %234 : vector<8x128xf32>
      %265 = arith.mulf %249, %257 : vector<8x128xf32>
      %266 = arith.addf %264, %265 : vector<8x128xf32>
      %267 = math.tanh %266 : vector<8x128xf32>
      %268 = arith.mulf %263, %267 : vector<8x128xf32>
      %c7 = arith.constant 7 : index
      %c0_86 = arith.constant 0 : index
      %c0_87 = arith.constant 0 : index
      %269 = vector.load %arg6[%c7, %c0_86, %c0_87] : memref<8x8x128xf32, #tpu.memory_space<vmem>>, vector<1x8x128xf32>
      %270 = vector.shape_cast %269 : vector<1x8x128xf32> to vector<8x128xf32>
      %271 = vector.shape_cast %268 : vector<8x128xf32> to vector<1x8x128xf32>
      tpu.vector_store %arg6[%c7, %c0_86, %c0_87], %271 {strides = array<i32>} : memref<8x8x128xf32, #tpu.memory_space<vmem>>, vector<1x8x128xf32>,
      %c0_88 = arith.constant 0 : index
      %c0_89 = arith.constant 0 : index
      %272 = vector.load %arg7[%c0_88, %c0_89] : memref<8x128xf32, #tpu.memory_space<vmem>>, vector<8x128xf32>
      tpu.vector_store %arg7[%c0_88, %c0_89], %268 {strides = array<i32>} : memref<8x128xf32, #tpu.memory_space<vmem>>, vector<8x128xf32>,
      %c0_90 = arith.constant 0 : index
      %c0_91 = arith.constant 0 : index
      %273 = vector.load %arg8[%c0_90, %c0_91] : memref<8x128xf32, #tpu.memory_space<vmem>>, vector<8x128xf32>
      tpu.vector_store %arg8[%c0_90, %c0_91], %266 {strides = array<i32>} : memref<8x128xf32, #tpu.memory_space<vmem>>, vector<8x128xf32>,
      %c0_92 = arith.constant 0 : index
      %c0_93 = arith.constant 0 : index
      %274 = vector.load %arg10[%c0_92, %c0_93] : memref<8x128xf32, #tpu.memory_space<vmem>>, vector<8x128xf32>
      tpu.vector_store %arg10[%c0_92, %c0_93], %268 {strides = array<i32>} : memref<8x128xf32, #tpu.memory_space<vmem>>, vector<8x128xf32>,
    } else {
    }
    return
  }
  func.func @transform_0(%arg0: i32, %arg1: i32) -> (i32, i32, i32) {
    %c0_i32 = arith.constant 0 : i32
    %c0_i32_0 = arith.constant 0 : i32
    return %arg1, %arg0, %c0_i32 : i32, i32, i32
  }
  func.func @transform_1(%arg0: i32, %arg1: i32) -> (i32, i32) {
    %c0_i32 = arith.constant 0 : i32
    %c0_i32_0 = arith.constant 0 : i32
    %c0_i32_1 = arith.constant 0 : i32
    return %c0_i32, %c0_i32_0 : i32, i32
  }
  func.func @transform_2(%arg0: i32, %arg1: i32) -> (i32, i32) {
    %c0_i32 = arith.constant 0 : i32
    %c0_i32_0 = arith.constant 0 : i32
    %c0_i32_1 = arith.constant 0 : i32
    return %c0_i32, %c0_i32_0 : i32, i32
  }
  func.func @transform_3(%arg0: i32, %arg1: i32) -> (i32, i32) {
    %c0_i32 = arith.constant 0 : i32
    %c0_i32_0 = arith.constant 0 : i32
    %c0_i32_1 = arith.constant 0 : i32
    return %c0_i32, %c0_i32_0 : i32, i32
  }
  func.func @transform_4(%arg0: i32, %arg1: i32) -> (i32, i32, i32) {
    %c0_i32 = arith.constant 0 : i32
    %c0_i32_0 = arith.constant 0 : i32
    return %arg1, %arg0, %c0_i32 : i32, i32, i32
  }
  func.func @transform_5(%arg0: i32, %arg1: i32) -> (i32, i32) {
    %c0_i32 = arith.constant 0 : i32
    %c0_i32_0 = arith.constant 0 : i32
    return %arg0, %c0_i32 : i32, i32
  }
  func.func @transform_6(%arg0: i32, %arg1: i32) -> (i32, i32) {
    %c0_i32 = arith.constant 0 : i32
    %c0_i32_0 = arith.constant 0 : i32
    return %arg0, %c0_i32 : i32, i32
  }
}

</mosaic_0001>

<bundles_post_ra>
// kernel: encoder_forward.2
= control target key start
LH: loop header
LB: loop body
LE: loop exit
PB: predicated region body
PF: predicated region fallthrough
CT: control target
= control target key end

     0   :  { %12 = vsyncpa [#allocation5], 0  ;;  %s4007_s0 = inlined_call_operand.hbm [shape: f32[8,8,128], index: 0, kind: input, shape index: {}]   ;;  %s4008_s1 = inlined_call_operand.hbm [shape: f32[128,512], index: 1, kind: input, shape index: {}]   ;;  %s4009_s2 = inlined_call_operand.hbm [shape: f32[128,512], index: 2, kind: input, shape index: {}]   ;;  %s4010_s3 = inlined_call_operand.hbm [shape: f32[1,512], index: 3, kind: input, shape index: {}]   ;;  %s4011_s4 = inlined_call_operand.hbm [shape: f32[8,8,128], index: 4, kind: output, shape index: {0}]   ;;  %s4012_s5 = inlined_call_operand.hbm [shape: f32[8,128], index: 5, kind: output, shape index: {1}]   ;;  %s4013_s6 = inlined_call_operand.hbm [shape: f32[8,128], index: 6, kind: output, shape index: {2}]  }
   0x1   :  { %13 = vsyncpa [#allocation8], 0 }
   0x2   :  { %14 = vsyncpa [#allocation11], 0 }
   0x3   :  { %15 = vsyncpa [#allocation6], 0 }
   0x4   :  { %16 = vsyncpa [#allocation14], 0  ;;  %s3376_s21 = smov [#allocation7]   ;;  %s3212_s25 = scalar_lea.hbm %s4008_s1, 8192 }
   0x5   :  { %s34_s22 = sshll.u32 %s3376_s21, 4  ;;  %p3213_p0 = scmp.ne.s32.totalorder %s4008_s1, %s3212_s25  ;;  %s35_s22 = int_to_ptr.vmem [resolvable:$true] %s34_s22 }
   0x6   :  { %p3216_p1 = scmp.lt.u32.totalorder %s3212_s25, %s4008_s1 }
   0x8   :  { %p3218_p2 = pnand %p3216_p1, %p3213_p0 }
   0xa   :  { %3221 = shalt.err (!%p3218_p2)
}
   0xb   :  { %s3222_s30 = scalar_lea.vmem %s35_s22, 8192  ;;  %p3227_p4 = scmp.lt.s32.totalorder %s35_s22, %s35_s22 }
   0xc   :  { %p3223_p3 = scmp.ne.s32.totalorder %s35_s22, %s3222_s30  ;;  %p3228_p5 = scmp.lt.s32.totalorder %s3222_s30, %s3222_s30 }
   0xe   :  { %p3229_p6 = por %p3228_p5, %p3227_p4 }
  0x10   :  { %p3230_p7 = pnand %p3229_p6, %p3223_p3 }
  0x12   :  { %3233 = shalt.err (!%p3230_p7)
}
  0x13   :  { %s3377_s7 = smov 512   ;;  %s3378_s8 = smov 32  }
  0x14   :  { %40 = dma.hbm_to_vmem [thread:$0]  %s4008_s1, 8192, %s35_s22, [#allocation8], %s3377_s7, %s3377_s7, %s3378_s8  }
  0x15   :  { %s3379_s11 = smov [#allocation4]   ;;  %s3234_s15 = scalar_lea.hbm %s4007_s0, 1024 }
  0x16   :  { %s22_s12 = sshll.u32 %s3379_s11, 4  ;;  %p3235_p8 = scmp.ne.s32.totalorder %s4007_s0, %s3234_s15  ;;  %s23_s12 = int_to_ptr.vmem [resolvable:$true] %s22_s12 }
  0x17   :  { %p3238_p9 = scmp.lt.u32.totalorder %s3234_s15, %s4007_s0 }
  0x19   :  { %p3240_p10 = pnand %p3238_p9, %p3235_p8 }
  0x1b   :  { %3243 = shalt.err (!%p3240_p10)
}
  0x1c   :  { %s3244_s20 = scalar_lea.vmem %s23_s12, 1024  ;;  %p3249_p12 = scmp.lt.s32.totalorder %s23_s12, %s23_s12 }
  0x1d   :  { %p3245_p11 = scmp.ne.s32.totalorder %s23_s12, %s3244_s20  ;;  %p3250_p13 = scmp.lt.s32.totalorder %s3244_s20, %s3244_s20 }
  0x1f   :  { %p3251_p0 = por %p3250_p13, %p3249_p12 }
  0x21   :  { %p3252_p1 = pnand %p3251_p0, %p3245_p11 }
  0x23   :  { %3255 = shalt.err (!%p3252_p1)
}
  0x24   :  { %s3380_s1 = smov 128   ;;  %s3381_s21 = smov 8  }
  0x25   :  { %28 = dma.hbm_to_vmem [thread:$0]  %s4007_s0, 1024, %s23_s12, [#allocation5], %s3380_s1, %s3380_s1, %s3381_s21  }
  0x26   :  { %s3382_s24 = smov [#allocation9]   ;;  %s3383_s26 = smov [#allocation10]  }
  0x27   :  { %s46_s25 = sshll.u32 %s3382_s24, 4  ;;  %s59_s27 = sshll.u32 %s3383_s26, 4  ;;  %s47_s25 = int_to_ptr.vmem [resolvable:$true] %s46_s25  ;;  %s60_s27 = int_to_ptr.vmem [resolvable:$true] %s59_s27 }
  0x28   :  { %s3256_s30 = scalar_lea.hbm %s4009_s2, 8192 }
  0x29   :  { %p3257_p2 = scmp.ne.s32.totalorder %s4009_s2, %s3256_s30  ;;  %p3260_p3 = scmp.lt.u32.totalorder %s3256_s30, %s4009_s2 }
  0x2b   :  { %p3262_p4 = pnand %p3260_p3, %p3257_p2 }
  0x2d   :  { %3265 = shalt.err (!%p3262_p4)
}
  0x2e   :  { %s3266_s0 = scalar_lea.vmem %s47_s25, 8192  ;;  %p3271_p6 = scmp.lt.s32.totalorder %s47_s25, %s47_s25 }
  0x2f   :  { %p3267_p5 = scmp.ne.s32.totalorder %s47_s25, %s3266_s0  ;;  %p3272_p7 = scmp.lt.s32.totalorder %s3266_s0, %s3266_s0 }
  0x31   :  { %p3273_p8 = por %p3272_p7, %p3271_p6 }
  0x33   :  { %p3274_p9 = pnand %p3273_p8, %p3267_p5 }
  0x35   :  { %3277 = shalt.err (!%p3274_p9)
}
  0x36   :  { %52 = dma.hbm_to_vmem [thread:$0]  %s4009_s2, 8192, %s47_s25, [#allocation8], %s3377_s7, %s3377_s7, %s3378_s8  }
  0x37   :  { %s3278_s17 = scalar_lea.hbm %s4010_s3, 64 }
  0x38   :  { %p3279_p10 = scmp.ne.s32.totalorder %s4010_s3, %s3278_s17  ;;  %p3282_p11 = scmp.lt.u32.totalorder %s3278_s17, %s4010_s3 }
  0x3a   :  { %p3284_p12 = pnand %p3282_p11, %p3279_p10 }
  0x3c   :  { %3287 = shalt.err (!%p3284_p12)
}
  0x3d   :  { %s3288_s23 = scalar_lea.vmem %s60_s27, 64  ;;  %p3293_p0 = scmp.lt.s32.totalorder %s60_s27, %s60_s27 }
  0x3e   :  { %p3289_p13 = scmp.ne.s32.totalorder %s60_s27, %s3288_s23  ;;  %p3294_p1 = scmp.lt.s32.totalorder %s3288_s23, %s3288_s23 }
  0x40   :  { %p3295_p2 = por %p3294_p1, %p3293_p0 }
  0x42   :  { %p3296_p3 = pnand %p3295_p2, %p3289_p13 }
  0x44   :  { %3299 = shalt.err (!%p3296_p3)
}
  0x45   :  { %62 = dma.hbm_to_vmem [thread:$0]  %s4010_s3, 64, %s60_s27, [#allocation11]  }
  0x46   :  { %3366 = dma.done.wait [#allocation5], 1024  }
  0x47   :  { %3367 = vsyncadd [#allocation5], 4294966272 }
  0x48   :  { %3368 = dma.done.wait [#allocation8], 16384  }
  0x49   :  { %3369 = vsyncadd [#allocation8], 4294950912 }
  0x4a   :  { %3370 = dma.done.wait [#allocation11], 64  }
  0x4b   :  { %3371 = vsyncadd [#allocation11], 4294967232  ;;  %v3384_v0 = vmov 0.0   ;;  %v91_v1 = vld [vmem:[#allocation7 + $0x8] sm:$0xff]  ;;  %v93_v3 = vld [vmem:[#allocation7 + $0x18] sm:$0xff]  ;;  %s3385_s3 = smov [#allocation13]  }
  0x4c   :  { %240 = vmatprep.mubr.f32.mxu0 %v3384_v0  ;;  %353 = vmatprep.mubr.f32.mxu1 %v3384_v0  ;;  %v95_v2 = vld [vmem:[#allocation7 + $0x28] sm:$0xff]  ;;  %v97_v5 = vld [vmem:[#allocation7 + $0x38] sm:$0xff]  ;;  %v90_v6 = vld [vmem:[#allocation7] sm:$0xff]  ;;  %s2380_s8 = sshll.u32 %s3385_s3, 4  ;;  %s3386_s24 = smov [#allocation12]   ;;  %s2381_s8 = int_to_ptr.vmem [resolvable:$true] %s2380_s8 }
  0x4d   :  { %v2432_v4 = vpack.c.bf16 %v95_v2, %v91_v1  ;;  %v94_v7 = vld [vmem:[#allocation7 + $0x20] sm:$0xff]  ;;  %v2464_v8 = vpack.c.bf16 %v97_v5, %v93_v3  ;;  %v92_v10 = vld [vmem:[#allocation7 + $0x10] sm:$0xff]  ;;  %v99_v12 = vld [vmem:[#allocation7 + $0x48] sm:$0xff]  ;;  %s2367_s25 = sshll.u32 %s3386_s24, 4  ;;  %s3387_s26 = smov [#allocation15]   ;;  %s3954_s25 = int_to_ptr.vmem [resolvable:$true] %s2367_s25 }
  0x4e   :  { %v2434_v9 = vpack.c.bf16 %v94_v7, %v90_v6  ;;  %v96_v11 = vld [vmem:[#allocation7 + $0x30] sm:$0xff]  ;;  %v103_v14 = vld [vmem:[#allocation7 + $0x68] sm:$0xff]  ;;  %v101_v15 = vld [vmem:[#allocation7 + $0x58] sm:$0xff]  ;;  %s2390_s27 = sshll.u32 %s3387_s26, 4  ;;  %s3300_s28 = scalar_lea.vmem %s2381_s8, 128  ;;  %s3956_s27 = int_to_ptr.vmem [resolvable:$true] %s2390_s27 }
  0x4f   :  { %2433 = vmatprep.subr.bf16.mxu0 %v2432_v4  ;;  %v2466_v13 = vpack.c.bf16 %v96_v11, %v92_v10  ;;  %v105_v16 = vld [vmem:[#allocation7 + $0x78] sm:$0xff]  ;;  %2465 = vmatprep.subr.bf16.mxu1 %v2464_v8  ;;  %v2436_v17 = vpack.c.bf16 %v103_v14, %v99_v12  ;;  %v98_v19 = vld [vmem:[#allocation7 + $0x40] sm:$0xff]  ;;  %v100_v21 = vld [vmem:[#allocation7 + $0x50] sm:$0xff]  ;;  %p3301_p4 = scmp.ne.s32.totalorder %s2381_s8, %s3300_s28  ;;  %p3305_p5 = scmp.lt.s32.totalorder %s2381_s8, %s2381_s8 }
  0x50   :  { %2435 = vmatpush1.bf16.msra.mxu0 %v2434_v9  ;;  %v2468_v18 = vpack.c.bf16 %v105_v16, %v101_v15  ;;  %v102_v20 = vld [vmem:[#allocation7 + $0x60] sm:$0xff]  ;;  %v104_v23 = vld [vmem:[#allocation7 + $0x70] sm:$0xff]  ;;  %v107_v24 = vld [vmem:[#allocation7 + $0x88] sm:$0xff]  ;;  %p3306_p6 = scmp.lt.s32.totalorder %s3300_s28, %s3300_s28 }
  0x51   :  { %2467 = vmatpush1.bf16.msra.mxu1 %v2466_v13  ;;  %v2438_v22 = vpack.c.bf16 %v102_v20, %v98_v19  ;;  %v111_v25 = vld [vmem:[#allocation7 + $0xa8] sm:$0xff]  ;;  %2437 = vmatprep.subr.bf16.mxu0 %v2436_v17  ;;  %v2470_v26 = vpack.c.bf16 %v104_v23, %v100_v21  ;;  %v109_v28 = vld [vmem:[#allocation7 + $0x98] sm:$0xff]  ;;  %v106_v30 = vld [vmem:[#allocation7 + $0x80] sm:$0xff] }
  0x52   :  { %2469 = vmatprep.subr.bf16.mxu1 %v2468_v18  ;;  %v2440_v27 = vpack.c.bf16 %v111_v25, %v107_v24  ;;  %v113_v29 = vld [vmem:[#allocation7 + $0xb8] sm:$0xff]  ;;  %v110_v32 = vld [vmem:[#allocation7 + $0xa0] sm:$0xff]  ;;  %v108_v33 = vld [vmem:[#allocation7 + $0x90] sm:$0xff]  ;;  %p3307_p7 = por %p3306_p6, %p3305_p5 }
  0x53   :  { %v2472_v31 = vpack.c.bf16 %v113_v29, %v109_v28  ;;  %v112_v34 = vld [vmem:[#allocation7 + $0xb0] sm:$0xff]  ;;  %v2442_v35 = vpack.c.bf16 %v110_v32, %v106_v30  ;;  %v115_v36 = vld [vmem:[#allocation7 + $0xc8] sm:$0xff]  ;;  %v117_v38 = vld [vmem:[#allocation7 + $0xd8] sm:$0xff] }
  0x54   :  { %2439 = vmatpush1.bf16.msra.mxu0 %v2438_v22  ;;  %v119_v37 = vld [vmem:[#allocation7 + $0xe8] sm:$0xff]  ;;  %v2474_v39 = vpack.c.bf16 %v112_v34, %v108_v33  ;;  %v121_v41 = vld [vmem:[#allocation7 + $0xf8] sm:$0xff]  ;;  %v114_v42 = vld [vmem:[#allocation7 + $0xc0] sm:$0xff]  ;;  %p3308_p8 = pnand %p3307_p7, %p3301_p4 }
  0x55   :  { %2471 = vmatpush1.bf16.msra.mxu1 %v2470_v26  ;;  %2441 = vmatprep.subr.bf16.mxu0 %v2440_v27  ;;  %v2444_v40 = vpack.c.bf16 %v119_v37, %v115_v36  ;;  %v118_v43 = vld [vmem:[#allocation7 + $0xe0] sm:$0xff]  ;;  %v2476_v44 = vpack.c.bf16 %v121_v41, %v117_v38  ;;  %v116_v45 = vld [vmem:[#allocation7 + $0xd0] sm:$0xff]  ;;  %v123_v47 = vld [vmem:[#allocation7 + $0x108] sm:$0xff] }
  0x56   :  { %2473 = vmatprep.subr.bf16.mxu1 %v2472_v31  ;;  %v120_v46 = vld [vmem:[#allocation7 + $0xf0] sm:$0xff]  ;;  %v127_v48 = vld [vmem:[#allocation7 + $0x128] sm:$0xff]  ;;  %v125_v49 = vld [vmem:[#allocation7 + $0x118] sm:$0xff]  ;;  %v2446_v51 = vpack.c.bf16 %v118_v43, %v114_v42 }
  0x57   :  { %v129_v50 = vld [vmem:[#allocation7 + $0x138] sm:$0xff]  ;;  %v2478_v52 = vpack.c.bf16 %v120_v46, %v116_v45  ;;  %v2448_v53 = vpack.c.bf16 %v127_v48, %v123_v47  ;;  %v122_v54 = vld [vmem:[#allocation7 + $0x100] sm:$0xff]  ;;  %v124_v56 = vld [vmem:[#allocation7 + $0x110] sm:$0xff] }
  0x58   :  { %2443 = vmatpush1.bf16.msra.mxu0 %v2442_v35  ;;  %v126_v55 = vld [vmem:[#allocation7 + $0x120] sm:$0xff]  ;;  %v2480_v57 = vpack.c.bf16 %v129_v50, %v125_v49  ;;  %v128_v58 = vld [vmem:[#allocation7 + $0x130] sm:$0xff]  ;;  %v131_v59 = vld [vmem:[#allocation7 + $0x148] sm:$0xff] }
  0x59   :  { %2475 = vmatpush1.bf16.msra.mxu1 %v2474_v39  ;;  %2445 = vmatprep.subr.bf16.mxu0 %v2444_v40  ;;  %v135_v60 = vld [vmem:[#allocation7 + $0x168] sm:$0xff]  ;;  %v133_v61 = vld [vmem:[#allocation7 + $0x158] sm:$0xff]  ;;  %v2450_v63 = vpack.c.bf16 %v126_v55, %v122_v54  ;;  %v2482_v1 = vpack.c.bf16 %v128_v58, %v124_v56  ;;  %v130_v3 = vld [vmem:[#allocation7 + $0x140] sm:$0xff] }
  0x5a   :  { %2477 = vmatprep.subr.bf16.mxu1 %v2476_v44  ;;  %v137_v62 = vld [vmem:[#allocation7 + $0x178] sm:$0xff]  ;;  %v2452_v2 = vpack.c.bf16 %v135_v60, %v131_v59  ;;  %v134_v4 = vld [vmem:[#allocation7 + $0x160] sm:$0xff]  ;;  %v132_v5 = vld [vmem:[#allocation7 + $0x150] sm:$0xff] }
  0x5b   :  { %v2484_v6 = vpack.c.bf16 %v137_v62, %v133_v61  ;;  %v136_v7 = vld [vmem:[#allocation7 + $0x170] sm:$0xff]  ;;  %v139_v8 = vld [vmem:[#allocation7 + $0x188] sm:$0xff]  ;;  %v141_v10 = vld [vmem:[#allocation7 + $0x198] sm:$0xff]  ;;  %v2454_v12 = vpack.c.bf16 %v134_v4, %v130_v3 }
  0x5c   :  { %2447 = vmatpush1.bf16.msra.mxu0 %v2446_v51  ;;  %v143_v9 = vld [vmem:[#allocation7 + $0x1a8] sm:$0xff]  ;;  %v145_v11 = vld [vmem:[#allocation7 + $0x1b8] sm:$0xff]  ;;  %v2486_v13 = vpack.c.bf16 %v136_v7, %v132_v5  ;;  %v138_v15 = vld [vmem:[#allocation7 + $0x180] sm:$0xff] }
  0x5d   :  { %2479 = vmatpush1.bf16.msra.mxu1 %v2478_v52  ;;  %2449 = vmatprep.subr.bf16.mxu0 %v2448_v53  ;;  %v2456_v14 = vpack.c.bf16 %v143_v9, %v139_v8  ;;  %v142_v16 = vld [vmem:[#allocation7 + $0x1a0] sm:$0xff]  ;;  %v140_v17 = vld [vmem:[#allocation7 + $0x190] sm:$0xff]  ;;  %v2488_v18 = vpack.c.bf16 %v145_v11, %v141_v10  ;;  %v147_v20 = vld [vmem:[#allocation7 + $0x1c8] sm:$0xff] }
  0x5e   :  { %2481 = vmatprep.subr.bf16.mxu1 %v2480_v57  ;;  %v144_v19 = vld [vmem:[#allocation7 + $0x1b0] sm:$0xff]  ;;  %v151_v21 = vld [vmem:[#allocation7 + $0x1e8] sm:$0xff]  ;;  %v149_v22 = vld [vmem:[#allocation7 + $0x1d8] sm:$0xff]  ;;  %v2458_v24 = vpack.c.bf16 %v142_v16, %v138_v15 }
  0x5f   :  { %v153_v23 = vld [vmem:[#allocation7 + $0x1f8] sm:$0xff]  ;;  %v2490_v25 = vpack.c.bf16 %v144_v19, %v140_v17  ;;  %v2460_v26 = vpack.c.bf16 %v151_v21, %v147_v20  ;;  %v146_v27 = vld [vmem:[#allocation7 + $0x1c0] sm:$0xff]  ;;  %v148_v29 = vld [vmem:[#allocation7 + $0x1d0] sm:$0xff] }
  0x60   :  { %2451 = vmatpush1.bf16.msra.mxu0 %v2450_v63  ;;  %v150_v28 = vld [vmem:[#allocation7 + $0x1e0] sm:$0xff]  ;;  %v2492_v30 = vpack.c.bf16 %v153_v23, %v149_v22  ;;  %v152_v31 = vld [vmem:[#allocation7 + $0x1f0] sm:$0xff]  ;;  %v445_v32 = vld [vmem:[#allocation9 + $0x8] sm:$0xff] }
  0x61   :  { %2483 = vmatpush1.bf16.msra.mxu1 %v2482_v1  ;;  %2453 = vmatprep.subr.bf16.mxu0 %v2452_v2  ;;  %v449_v33 = vld [vmem:[#allocation9 + $0x28] sm:$0xff]  ;;  %v447_v34 = vld [vmem:[#allocation9 + $0x18] sm:$0xff]  ;;  %v2462_v36 = vpack.c.bf16 %v150_v28, %v146_v27  ;;  %v2494_v37 = vpack.c.bf16 %v152_v31, %v148_v29  ;;  %v444_v39 = vld [vmem:[#allocation9] sm:$0xff] }
  0x62   :  { %2485 = vmatprep.subr.bf16.mxu1 %v2484_v6  ;;  %v451_v35 = vld [vmem:[#allocation9 + $0x38] sm:$0xff]  ;;  %v3482_v38 = vpack.c.bf16 %v449_v33, %v445_v32  ;;  %v448_v40 = vld [vmem:[#allocation9 + $0x20] sm:$0xff]  ;;  %v446_v42 = vld [vmem:[#allocation9 + $0x10] sm:$0xff] }
  0x63   :  { %v3484_v41 = vpack.c.bf16 %v451_v35, %v447_v34  ;;  %v450_v43 = vld [vmem:[#allocation9 + $0x30] sm:$0xff]  ;;  %v453_v44 = vld [vmem:[#allocation9 + $0x48] sm:$0xff]  ;;  %v82_v46 = vld [vmem:[#allocation4] sm:$0xff]  ;;  %v3486_v47 = vpack.c.bf16 %v448_v40, %v444_v39 }
  0x64   :  { %2455 = vmatpush1.bf16.msra.mxu0 %v2454_v12  ;;  %v457_v45 = vld [vmem:[#allocation9 + $0x68] sm:$0xff]  ;;  %v455_v48 = vld [vmem:[#allocation9 + $0x58] sm:$0xff]  ;;  %v3489_v50 = vpack.c.bf16 %v450_v43, %v446_v42  ;;  %v452_v51 = vld [vmem:[#allocation9 + $0x40] sm:$0xff] }
  0x65   :  { %2487 = vmatpush1.bf16.msra.mxu1 %v2486_v13  ;;  %2457 = vmatprep.subr.bf16.mxu0 %v2456_v14  ;;  %v459_v49 = vld [vmem:[#allocation9 + $0x78] sm:$0xff]  ;;  %v456_v52 = vld [vmem:[#allocation9 + $0x60] sm:$0xff]  ;;  %v3492_v53 = vpack.c.bf16 %v457_v45, %v453_v44  ;;  %v454_v54 = vld [vmem:[#allocation9 + $0x50] sm:$0xff] }
  0x66   :  { %2489 = vmatprep.subr.bf16.mxu1 %v2488_v18  ;;  %v458_v55 = vld [vmem:[#allocation9 + $0x70] sm:$0xff]  ;;  %v3494_v56 = vpack.c.bf16 %v459_v49, %v455_v48  ;;  %v461_v57 = vld [vmem:[#allocation9 + $0x88] sm:$0xff]  ;;  %v3497_v60 = vpack.c.bf16 %v456_v52, %v452_v51  ;;  %v463_v61 = vld [vmem:[#allocation9 + $0x98] sm:$0xff] }
  0x67   :  { %v465_v58 = vld [vmem:[#allocation9 + $0xa8] sm:$0xff]  ;;  %v467_v62 = vld [vmem:[#allocation9 + $0xb8] sm:$0xff]  ;;  %v3501_v63 = vpack.c.bf16 %v458_v55, %v454_v54  ;;  %v460_v1 = vld [vmem:[#allocation9 + $0x80] sm:$0xff] }
  0x68   :  { %2459 = vmatpush1.bf16.msra.mxu0 %v2458_v24  ;;  %v83_v59 = vld [vmem:[#allocation4 + $0x8] sm:$0xff]  ;;  %v464_v2 = vld [vmem:[#allocation9 + $0xa0] sm:$0xff]  ;;  %v3505_v3 = vpack.c.bf16 %v465_v58, %v461_v57  ;;  %v462_v4 = vld [vmem:[#allocation9 + $0x90] sm:$0xff]  ;;  %v3508_v6 = vpack.c.bf16 %v467_v62, %v463_v61 }
  0x69   :  { %2491 = vmatpush1.bf16.msra.mxu1 %v2490_v25  ;;  %2461 = vmatprep.subr.bf16.mxu0 %v2460_v26  ;;  %v466_v5 = vld [vmem:[#allocation9 + $0xb0] sm:$0xff]  ;;  %v469_v7 = vld [vmem:[#allocation9 + $0xc8] sm:$0xff]  ;;  %v3511_v10 = vpack.c.bf16 %v464_v2, %v460_v1  ;;  %v471_v11 = vld [vmem:[#allocation9 + $0xd8] sm:$0xff] }
  0x6a   :  { %2493 = vmatprep.subr.bf16.mxu1 %v2492_v30  ;;  %v473_v8 = vld [vmem:[#allocation9 + $0xe8] sm:$0xff]  ;;  %v84_v9 = vld [vmem:[#allocation4 + $0x10] sm:$0xff]  ;;  %v475_v12 = vld [vmem:[#allocation9 + $0xf8] sm:$0xff]  ;;  %v3515_v13 = vpack.c.bf16 %v466_v5, %v462_v4 }
  0x6b   :  { %v468_v14 = vld [vmem:[#allocation9 + $0xc0] sm:$0xff]  ;;  %v3519_v16 = vpack.c.bf16 %v473_v8, %v469_v7  ;;  %v470_v17 = vld [vmem:[#allocation9 + $0xd0] sm:$0xff]  ;;  %v3522_v19 = vpack.c.bf16 %v475_v12, %v471_v11  ;;  %v477_v20 = vld [vmem:[#allocation9 + $0x108] sm:$0xff] }
  0x6c   :  { %2463 = vmatpush1.bf16.msra.mxu0 %v2462_v36  ;;  %v472_v15 = vld [vmem:[#allocation9 + $0xe0] sm:$0xff]  ;;  %v474_v18 = vld [vmem:[#allocation9 + $0xf0] sm:$0xff]  ;;  %v481_v21 = vld [vmem:[#allocation9 + $0x128] sm:$0xff] }
  0x6d   :  { %2495 = vmatpush1.bf16.msra.mxu1 %v2494_v37  ;;  %2497 = vmatprep.subr.bf16.mxu0 %v3482_v38  ;;  %v85_v22 = vld [vmem:[#allocation4 + $0x18] sm:$0xff]  ;;  %v3525_v23 = vpack.c.bf16 %v472_v15, %v468_v14  ;;  %v3529_v26 = vpack.c.bf16 %v474_v18, %v470_v17  ;;  %v476_v27 = vld [vmem:[#allocation9 + $0x100] sm:$0xff]  ;;  %v3533_v29 = vpack.c.bf16 %v481_v21, %v477_v20  ;;  %v478_v30 = vld [vmem:[#allocation9 + $0x110] sm:$0xff] }
  0x6e   :  { %2529 = vmatprep.subr.bf16.mxu1 %v3484_v41  ;;  %v479_v24 = vld [vmem:[#allocation9 + $0x118] sm:$0xff]  ;;  %v480_v28 = vld [vmem:[#allocation9 + $0x120] sm:$0xff]  ;;  %v482_v31 = vld [vmem:[#allocation9 + $0x130] sm:$0xff] }
  0x6f   :  { %241 = vmatmul.mubr.f32.vlgmr.msra.gmra.mrb[0].mxu0 %v82_v46  ;;  %v483_v25 = vld [vmem:[#allocation9 + $0x138] sm:$0xff]  ;;  %v485_v33 = vld [vmem:[#allocation9 + $0x148] sm:$0xff]  ;;  %v86_v35 = vld [vmem:[#allocation4 + $0x20] sm:$0xff]  ;;  %v3539_v36 = vpack.c.bf16 %v480_v28, %v476_v27  ;;  %v3543_v40 = vpack.c.bf16 %v482_v31, %v478_v30  ;;  %v156_v28 = vlaneseq }
  0x70   :  { %354 = vmatmul.mubr.f32.vlgmr.msra.gmra.mrb[0].mxu1 %v82_v46  ;;  %2499 = vmatpush1.bf16.msra.mxu0 %v3486_v47  ;;  %v3536_v32 = vpack.c.bf16 %v483_v25, %v479_v24  ;;  %v489_v34 = vld [vmem:[#allocation9 + $0x168] sm:$0xff]  ;;  %v487_v37 = vld [vmem:[#allocation9 + $0x158] sm:$0xff]  ;;  %v484_v42 = vld [vmem:[#allocation9 + $0x140] sm:$0xff] }
  0x71   :  { %2531 = vmatpush1.bf16.msra.mxu1 %v3489_v50  ;;  %246 = vmatprep.mubr.f32.mxu0 %v3384_v0  ;;  %v491_v39 = vld [vmem:[#allocation9 + $0x178] sm:$0xff]  ;;  %v488_v43 = vld [vmem:[#allocation9 + $0x160] sm:$0xff]  ;;  %v3547_v44 = vpack.c.bf16 %v489_v34, %v485_v33  ;;  %v486_v45 = vld [vmem:[#allocation9 + $0x150] sm:$0xff]  ;;  %v157_v30 = vshrl.u32 %v156_v28, 7 }
  0x72   :  { %359 = vmatprep.mubr.f32.mxu1 %v3384_v0  ;;  %2501 = vmatprep.subr.bf16.mxu0 %v3492_v53  ;;  %v490_v46 = vld [vmem:[#allocation9 + $0x170] sm:$0xff]  ;;  %v3550_v48 = vpack.c.bf16 %v491_v39, %v487_v37  ;;  %v493_v49 = vld [vmem:[#allocation9 + $0x188] sm:$0xff]  ;;  %v3553_v54 = vpack.c.bf16 %v488_v43, %v484_v42  ;;  %v495_v55 = vld [vmem:[#allocation9 + $0x198] sm:$0xff] }
  0x73   :  { %247 = vmatmul.mubr.f32.gmra.mrb[2].mxu0 %v83_v59  ;;  %2533 = vmatprep.subr.bf16.mxu1 %v3494_v56  ;;  %v497_v51 = vld [vmem:[#allocation9 + $0x1a8] sm:$0xff]  ;;  %v499_v57 = vld [vmem:[#allocation9 + $0x1b8] sm:$0xff]  ;;  %v3557_v58 = vpack.c.bf16 %v490_v46, %v486_v45  ;;  %v496_v61 = vld [vmem:[#allocation9 + $0x1a0] sm:$0xff]  ;;  %v158_v31 = vsub.s32 0, %v157_v30  ;;  %v162_v34 = vsub.s32 1, %v157_v30  ;;  %v170_v42 = vsub.s32 3, %v157_v30 }
  0x74   :  { %360 = vmatmul.mubr.f32.gmra.mrb[2].mxu1 %v83_v59  ;;  %2503 = vmatpush1.bf16.msra.mxu0 %v3497_v60  ;;  %v87_v52 = vld [vmem:[#allocation4 + $0x28] sm:$0xff]  ;;  %v492_v59 = vld [vmem:[#allocation9 + $0x180] sm:$0xff]  ;;  %v3561_v62 = vpack.c.bf16 %v497_v51, %v493_v49  ;;  %v494_v1 = vld [vmem:[#allocation9 + $0x190] sm:$0xff]  ;;  %v3564_v4 = vpack.c.bf16 %v499_v57, %v495_v55  ;;  %v166_v55 = vsub.s32 2, %v157_v30 }
  0x75   :  { %2535 = vmatpush1.bf16.msra.mxu1 %v3501_v63  ;;  %252 = vmatprep.mubr.f32.mxu0 %v3384_v0  ;;  %v498_v2 = vld [vmem:[#allocation9 + $0x1b0] sm:$0xff]  ;;  %v501_v5 = vld [vmem:[#allocation9 + $0x1c8] sm:$0xff]  ;;  %v503_v11 = vld [vmem:[#allocation9 + $0x1d8] sm:$0xff] }
  0x76   :  { %365 = vmatprep.mubr.f32.mxu1 %v3384_v0  ;;  %2505 = vmatprep.subr.bf16.mxu0 %v3505_v3  ;;  %v505_v7 = vld [vmem:[#allocation9 + $0x1e8] sm:$0xff]  ;;  %v88_v8 = vld [vmem:[#allocation4 + $0x30] sm:$0xff]  ;;  %v507_v12 = vld [vmem:[#allocation9 + $0x1f8] sm:$0xff]  ;;  %v3571_v14 = vpack.c.bf16 %v498_v2, %v494_v1 }
  0x77   :  { %253 = vmatmul.mubr.f32.gmra.mrb[4].mxu0 %v84_v9  ;;  %2537 = vmatprep.subr.bf16.mxu1 %v3508_v6  ;;  %v500_v15 = vld [vmem:[#allocation9 + $0x1c0] sm:$0xff]  ;;  %v3575_v18 = vpack.c.bf16 %v505_v7, %v501_v5  ;;  %v502_v20 = vld [vmem:[#allocation9 + $0x1d0] sm:$0xff]  ;;  %v89_v24 = vld [vmem:[#allocation4 + $0x38] sm:$0xff] }
  0x78   :  { %366 = vmatmul.mubr.f32.gmra.mrb[4].mxu1 %v84_v9  ;;  %2507 = vmatpush1.bf16.msra.mxu0 %v3511_v10  ;;  %v3567_v9 = vpack.c.bf16 %v496_v61, %v492_v59  ;;  %v504_v17 = vld [vmem:[#allocation9 + $0x1e0] sm:$0xff]  ;;  %v506_v21 = vld [vmem:[#allocation9 + $0x1f0] sm:$0xff] }
  0x79   :  { %2539 = vmatpush1.bf16.msra.mxu1 %v3515_v13  ;;  %258 = vmatprep.mubr.f32.mxu0 %v3384_v0  ;;  %v3581_v25 = vpack.c.bf16 %v504_v17, %v500_v15  ;;  %v3585_v27 = vpack.c.bf16 %v506_v21, %v502_v20  ;;  %v154_v33 = vld [vmem:[#allocation10] sm:$0xf] }
  0x7a   :  { %371 = vmatprep.mubr.f32.mxu1 %v3384_v0  ;;  %2509 = vmatprep.subr.bf16.mxu0 %v3519_v16  ;;  %v3634_v37 = vrot.slane %v154_v33, %v162_v34  ;;  %v3641_v59 = vrot.slane %v154_v33, %v166_v55 }
  0x7b   :  { %259 = vmatmul.mubr.f32.gmra.mrb[6].mxu0 %v85_v22  ;;  %2541 = vmatprep.subr.bf16.mxu1 %v3522_v19 }
  0x7c   :  { %372 = vmatmul.mubr.f32.gmra.mrb[6].mxu1 %v85_v22  ;;  %2511 = vmatpush1.bf16.msra.mxu0 %v3525_v23  ;;  %v3578_v22 = vpack.c.bf16 %v507_v12, %v503_v11 }
  0x7d   :  { %2543 = vmatpush1.bf16.msra.mxu1 %v3529_v26  ;;  %264 = vmatprep.mubr.f32.mxu0 %v3384_v0 }
  0x7e   :  { %377 = vmatprep.mubr.f32.mxu1 %v3384_v0  ;;  %2513 = vmatprep.subr.bf16.mxu0 %v3533_v29 }
  0x7f   :  { %265 = vmatmul.mubr.f32.gmra.mrb[8].mxu0 %v86_v35  ;;  %2545 = vmatprep.subr.bf16.mxu1 %v3536_v32 }
  0x80   :  { %378 = vmatmul.mubr.f32.gmra.mrb[8].mxu1 %v86_v35  ;;  %2515 = vmatpush1.bf16.msra.mxu0 %v3539_v36  ;;  %v3632_v35 = vrot.slane %v154_v33, %v158_v31 }
  0x81   :  { %2547 = vmatpush1.bf16.msra.mxu1 %v3543_v40  ;;  %270 = vmatprep.mubr.f32.mxu0 %v3384_v0 }
  0x82   :  { %383 = vmatprep.mubr.f32.mxu1 %v3384_v0  ;;  %2517 = vmatprep.subr.bf16.mxu0 %v3547_v44 }
  0x83   :  { %271 = vmatmul.mubr.f32.gmra.mrb[10].mxu0 %v87_v52  ;;  %2549 = vmatprep.subr.bf16.mxu1 %v3550_v48 }
  0x84   :  { %384 = vmatmul.mubr.f32.gmra.mrb[10].mxu1 %v87_v52  ;;  %2519 = vmatpush1.bf16.msra.mxu0 %v3553_v54  ;;  %v3638_v52 = vrot.slane %v154_v33, %v170_v42 }
  0x85   :  { %2551 = vmatpush1.bf16.msra.mxu1 %v3557_v58  ;;  %276 = vmatprep.mubr.f32.mxu0 %v3384_v0 }
  0x86   :  { %389 = vmatprep.mubr.f32.mxu1 %v3384_v0  ;;  %2521 = vmatprep.subr.bf16.mxu0 %v3561_v62 }
  0x87   :  { %277 = vmatmul.mubr.f32.gmra.mrb[12].mxu0 %v88_v8  ;;  %2553 = vmatprep.subr.bf16.mxu1 %v3564_v4 }
  0x88   :  { %390 = vmatmul.mubr.f32.gmra.mrb[12].mxu1 %v88_v8  ;;  %2523 = vmatpush1.bf16.msra.mxu0 %v3567_v9 }
  0x89   :  { %2555 = vmatpush1.bf16.msra.mxu1 %v3571_v14  ;;  %282 = vmatprep.mubr.f32.mxu0 %v3384_v0 }
  0x8a   :  { %395 = vmatprep.mubr.f32.mxu1 %v3384_v0  ;;  %2525 = vmatprep.subr.bf16.mxu0 %v3575_v18 }
  0x8b   :  { %283 = vmatmul.mubr.f32.gmra.mrb[14].mxu0 %v89_v24  ;;  %2557 = vmatprep.subr.bf16.mxu1 %v3578_v22 }
  0x8c   :  { %396 = vmatmul.mubr.f32.gmra.mrb[14].mxu1 %v89_v24  ;;  %2527 = vmatpush1.bf16.msra.mxu0 %v3581_v25 }
  0x8d   :  { %2559 = vmatpush1.bf16.msra.mxu1 %v3585_v27  ;;  %572 = vmatprep.mubr.f32.mxu0 %v3384_v0 }
  0x8e   :  { %643 = vmatprep.mubr.f32.mxu1 %v3384_v0  ;;  %2561 = vmatprep.subr.bf16.mxu0 %v3482_v38 }
  0x8f   :  { %573 = vmatmul.mubr.f32.vlgmr.msra.gmra.mrb[0].mxu0 %v3384_v0  ;;  %2593 = vmatprep.subr.bf16.mxu1 %v3484_v41 }
  0x90   :  { %644 = vmatmul.mubr.f32.vlgmr.msra.gmra.mrb[0].mxu1 %v3384_v0  ;;  %2563 = vmatpush1.bf16.msra.mxu0 %v3486_v47 }
  0x91   :  { %2595 = vmatpush1.bf16.msra.mxu1 %v3489_v50  ;;  %2565 = vmatprep.subr.bf16.mxu0 %v3492_v53 }
  0x92   :  { %2597 = vmatprep.subr.bf16.mxu1 %v3494_v56  ;;  %811 = vmatprep.mubr.f32.mxu0 %v3384_v0 }
  0x93   :  { %882 = vmatprep.mubr.f32.mxu1 %v3384_v0 }
  0x94   :  { %2567 = vmatpush1.bf16.msra.mxu0 %v3497_v60 }
  0x95   :  { %2599 = vmatpush1.bf16.msra.mxu1 %v3501_v63  ;;  %2569 = vmatprep.subr.bf16.mxu0 %v3505_v3 }
  0x96   :  { %2601 = vmatprep.subr.bf16.mxu1 %v3508_v6 }
  0x98   :  { %2571 = vmatpush1.bf16.msra.mxu0 %v3511_v10 }
  0x99   :  { %2603 = vmatpush1.bf16.msra.mxu1 %v3515_v13  ;;  %2573 = vmatprep.subr.bf16.mxu0 %v3519_v16 }
  0x9a   :  { %2605 = vmatprep.subr.bf16.mxu1 %v3522_v19 }
  0x9c   :  { %2575 = vmatpush1.bf16.msra.mxu0 %v3525_v23 }
  0x9d   :  { %2607 = vmatpush1.bf16.msra.mxu1 %v3529_v26  ;;  %2577 = vmatprep.subr.bf16.mxu0 %v3533_v29 }
  0x9e   :  { %2609 = vmatprep.subr.bf16.mxu1 %v3536_v32 }
  0xa0   :  { %2579 = vmatpush1.bf16.msra.mxu0 %v3539_v36 }
  0xa1   :  { %2611 = vmatpush1.bf16.msra.mxu1 %v3543_v40  ;;  %2581 = vmatprep.subr.bf16.mxu0 %v3547_v44 }
  0xa2   :  { %2613 = vmatprep.subr.bf16.mxu1 %v3550_v48 }
  0xa4   :  { %2583 = vmatpush1.bf16.msra.mxu0 %v3553_v54 }
  0xa5   :  { %2615 = vmatpush1.bf16.msra.mxu1 %v3557_v58  ;;  %2585 = vmatprep.subr.bf16.mxu0 %v3561_v62 }
  0xa6   :  { %2617 = vmatprep.subr.bf16.mxu1 %v3564_v4 }
  0xa8   :  { %2587 = vmatpush1.bf16.msra.mxu0 %v3567_v9 }
  0xa9   :  { %2619 = vmatpush1.bf16.msra.mxu1 %v3571_v14  ;;  %2589 = vmatprep.subr.bf16.mxu0 %v3575_v18 }
  0xaa   :  { %2621 = vmatprep.subr.bf16.mxu1 %v3578_v22 }
  0xac   :  { %2591 = vmatpush1.bf16.msra.mxu0 %v3581_v25 }
  0xad   :  { %2623 = vmatpush1.bf16.msra.mxu1 %v3585_v27  ;;  %2625 = vmatprep.subr.bf16.mxu0 %v3482_v38 }
  0xae   :  { %2657 = vmatprep.subr.bf16.mxu1 %v3484_v41 }
 0x162   :  { %v574_v39 = vpop.f32.mrb[0].mxu0 }
 0x163   :  { %v3008_v43 = vadd.f32 %v574_v39, %v3632_v35  ;;  %v645_v45 = vpop.f32.mrb[0].mxu1  ;;  %v576_v46 = vpop.f32.mrb[1].mxu0 }
 0x164   :  { %v3009_v49 = vadd.f32 %v576_v46, %v3634_v37  ;;  %v647_v38 = vpop.f32.mrb[1].mxu1  ;;  %v3024_v1 = vadd.f32 %v645_v45, %v3641_v59 }
 0x165   :  { %v2408_v51 = vmul.f32 -1.442695, %v3008_v43  ;;  %v3025_v57 = vadd.f32 %v647_v38, %v3638_v52 }
 0x166   :  { %v2409_v41 = vmul.f32 -1.442695, %v3009_v49 }
 0x167   :  { %3084 = vpow2.f32 %v2408_v51  ;;  %v2410_v61 = vmul.f32 -1.442695, %v3025_v57 }
 0x168   :  { %3086 = vpow2.f32 %v2409_v41 }
 0x169   :  { %3088 = vpow2.f32 %v2410_v61 }
 0x16a   :  { %3090 = vtanh.f32 %v3024_v1 }
 0x171   :  { %v3085_v2 = vpop.eup %3084 }
 0x172   :  { %v3087_v5 = vpop.eup %3086  ;;  %v657_v7 = vadd.f32 1.0, %v3085_v2 }
 0x173   :  { %v663_v8 = vadd.f32 1.0, %v3087_v5  ;;  %v3089_v11 = vpop.eup %3088 }
 0x174   :  { %3092 = vrcp.f32 %v657_v7  ;;  %v3091_v12 = vpop.eup %3090  ;;  %v670_v21 = vadd.f32 1.0, %v3089_v11 }
 0x175   :  { %3094 = vrcp.f32 %v663_v8 }
 0x176   :  { %3096 = vrcp.f32 %v670_v21 }
 0x17e   :  { %v3093_v15 = vpop.eup %3092 }
 0x17f   :  { %v3095_v17 = vpop.eup %3094  ;;  %v674_v20 = vmul.f32 %v3093_v15, %v3091_v12  ;;  %v1164_v15 = vld [vmem:[#allocation9 + $0x8] sm:$0xff] }
 0x180   :  { %v673_v24 = vmul.f32 0.0, %v3095_v17  ;;  %v3097_v30 = vpop.eup %3096  ;;  %v1168_v17 = vld [vmem:[#allocation9 + $0x28] sm:$0xff] }
 0x181   :  { %v3689_v21 = vpack.c.bf16 %v1168_v17, %v1164_v15  ;;  %v1421_v15 = vld [vmem:[#allocation9 + $0x90] sm:$0xff] }
 0x182   :  { %v3644_v28 = vadd.f32 %v674_v20, %v673_v24  ;;  %v1166_v20 = vld [vmem:[#allocation9 + $0x18] sm:$0xff]  ;;  %v1425_v17 = vld [vmem:[#allocation9 + $0xb0] sm:$0xff] }
 0x183   :  { %v1170_v24 = vld [vmem:[#allocation9 + $0x38] sm:$0xff] }
 0x184   :  { %3098 = vtanh.f32 %v3644_v28 }
 0x18e   :  { %v3099_v31 = vpop.eup %3098 }
 0x18f   :  { %v677_v33 = vmul.f32 %v3099_v31, %v3097_v30  ;;  %v1167_v30 = vld [vmem:[#allocation9 + $0x20] sm:$0xff]  ;;  %v3691_v31 = vpack.c.bf16 %v1170_v24, %v1166_v20  ;;  %v3762_v20 = vpack.c.bf16 %v1425_v17, %v1421_v15  ;;  %v1428_v24 = vld [vmem:[#allocation9 + $0xc8] sm:$0xff]  ;;  %v1453_v15 = vld [vmem:[#allocation9 + $0x190] sm:$0xff] }
 0x191   :  { %678 = vst [vmem:[#allocation12] sm:$0xff] %v677_v33  ;;  %812 = vmatmul.mubr.f32.vlgmr.msra.gmra.mrb[2].mxu0 %v677_v33  ;;  %883 = vmatmul.mubr.f32.vlgmr.msra.gmra.mrb[2].mxu1 %v677_v33 }
 0x192   :  { %2627 = vmatpush1.bf16.msra.mxu0 %v3486_v47  ;;  %2659 = vmatpush1.bf16.msra.mxu1 %v3489_v50 }
 0x193   :  { %2629 = vmatprep.subr.bf16.mxu0 %v3492_v53  ;;  %2661 = vmatprep.subr.bf16.mxu1 %v3494_v56 }
 0x194   :  { %1051 = vmatprep.mubr.f32.mxu0 %v3384_v0  ;;  %1122 = vmatprep.mubr.f32.mxu1 %v3384_v0 }
 0x196   :  { %2631 = vmatpush1.bf16.msra.mxu0 %v3497_v60  ;;  %2663 = vmatpush1.bf16.msra.mxu1 %v3501_v63 }
 0x197   :  { %2633 = vmatprep.subr.bf16.mxu0 %v3505_v3  ;;  %2665 = vmatprep.subr.bf16.mxu1 %v3508_v6 }
 0x19a   :  { %2635 = vmatpush1.bf16.msra.mxu0 %v3511_v10  ;;  %2667 = vmatpush1.bf16.msra.mxu1 %v3515_v13 }
 0x19b   :  { %2637 = vmatprep.subr.bf16.mxu0 %v3519_v16  ;;  %2669 = vmatprep.subr.bf16.mxu1 %v3522_v19 }
 0x19e   :  { %2639 = vmatpush1.bf16.msra.mxu0 %v3525_v23  ;;  %2671 = vmatpush1.bf16.msra.mxu1 %v3529_v26 }
 0x19f   :  { %2641 = vmatprep.subr.bf16.mxu0 %v3533_v29  ;;  %2673 = vmatprep.subr.bf16.mxu1 %v3536_v32 }
 0x1a2   :  { %2643 = vmatpush1.bf16.msra.mxu0 %v3539_v36  ;;  %2675 = vmatpush1.bf16.msra.mxu1 %v3543_v40 }
 0x1a3   :  { %2645 = vmatprep.subr.bf16.mxu0 %v3547_v44  ;;  %2677 = vmatprep.subr.bf16.mxu1 %v3550_v48 }
 0x1a6   :  { %2647 = vmatpush1.bf16.msra.mxu0 %v3553_v54  ;;  %2679 = vmatpush1.bf16.msra.mxu1 %v3557_v58 }
 0x1a7   :  { %2649 = vmatprep.subr.bf16.mxu0 %v3561_v62  ;;  %2681 = vmatprep.subr.bf16.mxu1 %v3564_v4 }
 0x1aa   :  { %2651 = vmatpush1.bf16.msra.mxu0 %v3567_v9  ;;  %2683 = vmatpush1.bf16.msra.mxu1 %v3571_v14 }
 0x1ab   :  { %2653 = vmatprep.subr.bf16.mxu0 %v3575_v18  ;;  %2685 = vmatprep.subr.bf16.mxu1 %v3578_v22 }
 0x1ae   :  { %2655 = vmatpush1.bf16.msra.mxu0 %v3581_v25  ;;  %2687 = vmatpush1.bf16.msra.mxu1 %v3585_v27 }
 0x1af   :  { %2689 = vmatprep.subr.bf16.mxu0 %v3689_v21  ;;  %2721 = vmatprep.subr.bf16.mxu1 %v3691_v31 }
 0x264   :  { %v813_v47 = vpop.f32.mrb[2].mxu0  ;;  %v884_v50 = vpop.f32.mrb[2].mxu1 }
 0x265   :  { %v3010_v53 = vadd.f32 %v813_v47, %v3632_v35  ;;  %v815_v56 = vpop.f32.mrb[3].mxu0  ;;  %v886_v60 = vpop.f32.mrb[3].mxu1  ;;  %v3026_v45 = vadd.f32 %v884_v50, %v3641_v59  ;;  %v1165_v47 = vld [vmem:[#allocation9 + $0x10] sm:$0xff] }
 0x266   :  { %v3011_v63 = vadd.f32 %v815_v56, %v3634_v37  ;;  %v3027_v42 = vadd.f32 %v886_v60, %v3638_v52  ;;  %v1169_v50 = vld [vmem:[#allocation9 + $0x30] sm:$0xff]  ;;  %v1172_v56 = vld [vmem:[#allocation9 + $0x48] sm:$0xff] }
 0x267   :  { %v2411_v34 = vmul.f32 -1.442695, %v3010_v53  ;;  %v3696_v53 = vpack.c.bf16 %v1169_v50, %v1165_v47  ;;  %v1176_v60 = vld [vmem:[#allocation9 + $0x68] sm:$0xff]  ;;  %v1434_v50 = vld [vmem:[#allocation9 + $0xf8] sm:$0xff] }
 0x268   :  { %v2412_v39 = vmul.f32 -1.442695, %v3011_v63  ;;  %v2413_v43 = vmul.f32 -1.442695, %v3027_v42  ;;  %v1174_v63 = vld [vmem:[#allocation9 + $0x58] sm:$0xff]  ;;  %v1171_v42 = vld [vmem:[#allocation9 + $0x40] sm:$0xff] }
 0x269   :  { %3100 = vpow2.f32 %v2411_v34  ;;  %v3701_v34 = vpack.c.bf16 %v1176_v60, %v1172_v56  ;;  %v1427_v56 = vld [vmem:[#allocation9 + $0xc0] sm:$0xff] }
 0x26a   :  { %3102 = vpow2.f32 %v2412_v39  ;;  %v1178_v39 = vld [vmem:[#allocation9 + $0x78] sm:$0xff]  ;;  %v1431_v60 = vld [vmem:[#allocation9 + $0xe0] sm:$0xff] }
 0x26b   :  { %3104 = vpow2.f32 %v2413_v43  ;;  %v1175_v43 = vld [vmem:[#allocation9 + $0x60] sm:$0xff] }
 0x26c   :  { %3106 = vtanh.f32 %v3026_v45  ;;  %v3703_v45 = vpack.c.bf16 %v1178_v39, %v1174_v63  ;;  %v3771_v39 = vpack.c.bf16 %v1431_v60, %v1427_v56  ;;  %v1462_v60 = vld [vmem:[#allocation9 + $0x1d8] sm:$0xff] }
 0x273   :  { %v3101_v46 = vpop.eup %3100 }
 0x274   :  { %v3103_v49 = vpop.eup %3102  ;;  %v896_v38 = vadd.f32 1.0, %v3101_v46  ;;  %v3705_v46 = vpack.c.bf16 %v1175_v43, %v1171_v42  ;;  %v1429_v42 = vld [vmem:[#allocation9 + $0xd0] sm:$0xff] }
 0x275   :  { %v902_v51 = vadd.f32 1.0, %v3103_v49  ;;  %v3105_v41 = vpop.eup %3104  ;;  %v1173_v49 = vld [vmem:[#allocation9 + $0x50] sm:$0xff] }
 0x276   :  { %3108 = vrcp.f32 %v896_v38  ;;  %v3107_v55 = vpop.eup %3106  ;;  %v909_v2 = vadd.f32 1.0, %v3105_v41  ;;  %v1177_v38 = vld [vmem:[#allocation9 + $0x70] sm:$0xff] }
 0x277   :  { %3110 = vrcp.f32 %v902_v51  ;;  %v3708_v51 = vpack.c.bf16 %v1177_v38, %v1173_v49  ;;  %v1433_v43 = vld [vmem:[#allocation9 + $0xf0] sm:$0xff]  ;;  %v1436_v38 = vld [vmem:[#allocation9 + $0x108] sm:$0xff] }
 0x278   :  { %3112 = vrcp.f32 %v909_v2  ;;  %v3774_v49 = vpack.c.bf16 %v1433_v43, %v1429_v42  ;;  %v1466_v42 = vld [vmem:[#allocation9 + $0x1f8] sm:$0xff]  ;;  %v1459_v43 = vld [vmem:[#allocation9 + $0x1c0] sm:$0xff] }
 0x280   :  { %v3109_v57 = vpop.eup %3108 }
 0x281   :  { %v3111_v61 = vpop.eup %3110  ;;  %v913_v1 = vmul.f32 %v3109_v57, %v3107_v55  ;;  %v1420_v57 = vld [vmem:[#allocation9 + $0x88] sm:$0xff] }
 0x282   :  { %v912_v5 = vmul.f32 %v3111_v61, %v3644_v28  ;;  %v3113_v8 = vpop.eup %3112  ;;  %v1163_v28 = vld [vmem:[#allocation9] sm:$0xff]  ;;  %v1424_v61 = vld [vmem:[#allocation9 + $0xa8] sm:$0xff] }
 0x283   :  { %v3693_v33 = vpack.c.bf16 %v1167_v30, %v1163_v28  ;;  %v3755_v2 = vpack.c.bf16 %v1424_v61, %v1420_v57  ;;  %v1432_v28 = vld [vmem:[#allocation9 + $0xe8] sm:$0xff]  ;;  %v1430_v30 = vld [vmem:[#allocation9 + $0xd8] sm:$0xff] }
 0x284   :  { %v3684_v7 = vadd.f32 %v913_v1, %v912_v5  ;;  %v1422_v1 = vld [vmem:[#allocation9 + $0x98] sm:$0xff]  ;;  %v3767_v47 = vpack.c.bf16 %v1432_v28, %v1428_v24  ;;  %v3769_v63 = vpack.c.bf16 %v1434_v50, %v1430_v30  ;;  %v1457_v24 = vld [vmem:[#allocation9 + $0x1b0] sm:$0xff]  ;;  %v1460_v28 = vld [vmem:[#allocation9 + $0x1c8] sm:$0xff] }
 0x285   :  { %v1426_v5 = vld [vmem:[#allocation9 + $0xb8] sm:$0xff]  ;;  %v1464_v30 = vld [vmem:[#allocation9 + $0x1e8] sm:$0xff]  ;;  %v3810_v50 = vpack.c.bf16 %v1457_v24, %v1453_v15 }
 0x286   :  { %3114 = vtanh.f32 %v3684_v7  ;;  %v1454_v57 = vld [vmem:[#allocation9 + $0x198] sm:$0xff]  ;;  %v3812_v56 = vpack.c.bf16 %v1464_v30, %v1460_v28 }
 0x287   :  { %v1458_v61 = vld [vmem:[#allocation9 + $0x1b8] sm:$0xff] }
 0x290   :  { %v3115_v11 = vpop.eup %3114 }
 0x291   :  { %v916_v12 = vmul.f32 %v3115_v11, %v3113_v8  ;;  %v1423_v8 = vld [vmem:[#allocation9 + $0xa0] sm:$0xff]  ;;  %v3757_v11 = vpack.c.bf16 %v1426_v5, %v1422_v1  ;;  %v3803_v5 = vpack.c.bf16 %v1458_v61, %v1454_v57 }
 0x293   :  { %918 = vst [vmem:[#allocation12 + $0x8] sm:$0xff] %v916_v12  ;;  %1052 = vmatmul.mubr.f32.vlgmr.msra.gmra.mrb[4].mxu0 %v916_v12  ;;  %1123 = vmatmul.mubr.f32.vlgmr.msra.gmra.mrb[4].mxu1 %v916_v12 }
 0x294   :  { %1291 = vmatprep.mubr.f32.mxu0 %v3384_v0  ;;  %1362 = vmatprep.mubr.f32.mxu1 %v3384_v0 }
 0x295   :  { %2691 = vmatpush1.bf16.msra.mxu0 %v3693_v33  ;;  %2723 = vmatpush1.bf16.msra.mxu1 %v3696_v53 }
 0x296   :  { %2693 = vmatprep.subr.bf16.mxu0 %v3701_v34  ;;  %2725 = vmatprep.subr.bf16.mxu1 %v3703_v45 }
 0x299   :  { %2695 = vmatpush1.bf16.msra.mxu0 %v3705_v46  ;;  %2727 = vmatpush1.bf16.msra.mxu1 %v3708_v51 }
 0x29a   :  { %2697 = vmatprep.subr.bf16.mxu0 %v3505_v3  ;;  %2729 = vmatprep.subr.bf16.mxu1 %v3508_v6 }
 0x29d   :  { %2699 = vmatpush1.bf16.msra.mxu0 %v3511_v10  ;;  %2731 = vmatpush1.bf16.msra.mxu1 %v3515_v13 }
 0x29e   :  { %2701 = vmatprep.subr.bf16.mxu0 %v3519_v16  ;;  %2733 = vmatprep.subr.bf16.mxu1 %v3522_v19 }
 0x2a1   :  { %2703 = vmatpush1.bf16.msra.mxu0 %v3525_v23  ;;  %2735 = vmatpush1.bf16.msra.mxu1 %v3529_v26 }
 0x2a2   :  { %2705 = vmatprep.subr.bf16.mxu0 %v3533_v29  ;;  %2737 = vmatprep.subr.bf16.mxu1 %v3536_v32 }
 0x2a5   :  { %2707 = vmatpush1.bf16.msra.mxu0 %v3539_v36  ;;  %2739 = vmatpush1.bf16.msra.mxu1 %v3543_v40 }
 0x2a6   :  { %2709 = vmatprep.subr.bf16.mxu0 %v3547_v44  ;;  %2741 = vmatprep.subr.bf16.mxu1 %v3550_v48 }
 0x2a9   :  { %2711 = vmatpush1.bf16.msra.mxu0 %v3553_v54  ;;  %2743 = vmatpush1.bf16.msra.mxu1 %v3557_v58 }
 0x2aa   :  { %2713 = vmatprep.subr.bf16.mxu0 %v3561_v62  ;;  %2745 = vmatprep.subr.bf16.mxu1 %v3564_v4 }
 0x2ad   :  { %2715 = vmatpush1.bf16.msra.mxu0 %v3567_v9  ;;  %2747 = vmatpush1.bf16.msra.mxu1 %v3571_v14 }
 0x2ae   :  { %2717 = vmatprep.subr.bf16.mxu0 %v3575_v18  ;;  %2749 = vmatprep.subr.bf16.mxu1 %v3578_v22 }
 0x2b1   :  { %2719 = vmatpush1.bf16.msra.mxu0 %v3581_v25  ;;  %2751 = vmatpush1.bf16.msra.mxu1 %v3585_v27 }
 0x2b2   :  { %2753 = vmatprep.subr.bf16.mxu0 %v3689_v21  ;;  %2785 = vmatprep.subr.bf16.mxu1 %v3691_v31 }
 0x366   :  { %v1053_v3 = vpop.f32.mrb[4].mxu0  ;;  %v1124_v6 = vpop.f32.mrb[4].mxu1 }
 0x367   :  { %v3012_v10 = vadd.f32 %v1053_v3, %v3632_v35  ;;  %v1055_v13 = vpop.f32.mrb[5].mxu0  ;;  %v1126_v16 = vpop.f32.mrb[5].mxu1  ;;  %v3028_v36 = vadd.f32 %v1124_v6, %v3641_v59  ;;  %v1440_v3 = vld [vmem:[#allocation9 + $0x128] sm:$0xff]  ;;  %v1438_v6 = vld [vmem:[#allocation9 + $0x118] sm:$0xff] }
 0x368   :  { %v3013_v19 = vadd.f32 %v1055_v13, %v3634_v37  ;;  %v3029_v29 = vadd.f32 %v1126_v16, %v3638_v52  ;;  %v1442_v13 = vld [vmem:[#allocation9 + $0x138] sm:$0xff]  ;;  %v1435_v16 = vld [vmem:[#allocation9 + $0x100] sm:$0xff] }
 0x369   :  { %v2414_v23 = vmul.f32 -1.442695, %v3012_v10  ;;  %v3779_v10 = vpack.c.bf16 %v1440_v3, %v1436_v38  ;;  %v3815_v38 = vpack.c.bf16 %v1466_v42, %v1462_v60  ;;  %v1463_v3 = vld [vmem:[#allocation9 + $0x1e0] sm:$0xff] }
 0x36a   :  { %v2415_v26 = vmul.f32 -1.442695, %v3013_v19  ;;  %v2416_v32 = vmul.f32 -1.442695, %v3029_v29  ;;  %v1439_v19 = vld [vmem:[#allocation9 + $0x120] sm:$0xff]  ;;  %v1437_v29 = vld [vmem:[#allocation9 + $0x110] sm:$0xff] }
 0x36b   :  { %3116 = vpow2.f32 %v2414_v23  ;;  %v3781_v23 = vpack.c.bf16 %v1442_v13, %v1438_v6  ;;  %v1461_v6 = vld [vmem:[#allocation9 + $0x1d0] sm:$0xff] }
 0x36c   :  { %3118 = vpow2.f32 %v2415_v26  ;;  %v3783_v26 = vpack.c.bf16 %v1439_v19, %v1435_v16  ;;  %v1465_v13 = vld [vmem:[#allocation9 + $0x1f0] sm:$0xff]  ;;  %v3818_v16 = vpack.c.bf16 %v1463_v3, %v1459_v43 }
 0x36d   :  { %3120 = vpow2.f32 %v2416_v32  ;;  %v1441_v32 = vld [vmem:[#allocation9 + $0x130] sm:$0xff]  ;;  %v3822_v19 = vpack.c.bf16 %v1465_v13, %v1461_v6 }
 0x36e   :  { %3122 = vtanh.f32 %v3028_v36  ;;  %v3786_v36 = vpack.c.bf16 %v1441_v32, %v1437_v29 }
 0x375   :  { %v3117_v40 = vpop.eup %3116 }
 0x376   :  { %v3119_v44 = vpop.eup %3118  ;;  %v1136_v48 = vadd.f32 1.0, %v3117_v40  ;;  %v1444_v40 = vld [vmem:[#allocation9 + $0x148] sm:$0xff] }
 0x377   :  { %v1142_v54 = vadd.f32 1.0, %v3119_v44  ;;  %v3121_v58 = vpop.eup %3120  ;;  %v1448_v44 = vld [vmem:[#allocation9 + $0x168] sm:$0xff] }
 0x378   :  { %3124 = vrcp.f32 %v1136_v48  ;;  %v3123_v62 = vpop.eup %3122  ;;  %v1149_v18 = vadd.f32 1.0, %v3121_v58  ;;  %v1446_v48 = vld [vmem:[#allocation9 + $0x158] sm:$0xff] }
 0x379   :  { %3126 = vrcp.f32 %v1142_v54  ;;  %v3790_v54 = vpack.c.bf16 %v1448_v44, %v1444_v40  ;;  %v1450_v58 = vld [vmem:[#allocation9 + $0x178] sm:$0xff] }
 0x37a   :  { %3128 = vrcp.f32 %v1149_v18  ;;  %v1445_v18 = vld [vmem:[#allocation9 + $0x150] sm:$0xff] }
 0x382   :  { %v3125_v4 = vpop.eup %3124 }
 0x383   :  { %v3127_v9 = vpop.eup %3126  ;;  %v1153_v14 = vmul.f32 %v3125_v4, %v3123_v62  ;;  %v1443_v62 = vld [vmem:[#allocation9 + $0x140] sm:$0xff] }
 0x384   :  { %v1152_v22 = vmul.f32 %v3127_v9, %v3684_v7  ;;  %v3129_v27 = vpop.eup %3128  ;;  %v1419_v7 = vld [vmem:[#allocation9 + $0x80] sm:$0xff]  ;;  %v3793_v9 = vpack.c.bf16 %v1450_v58, %v1446_v48 }
 0x385   :  { %v3759_v12 = vpack.c.bf16 %v1423_v8, %v1419_v7  ;;  %v1447_v4 = vld [vmem:[#allocation9 + $0x160] sm:$0xff] }
 0x386   :  { %v3744_v25 = vadd.f32 %v1153_v14, %v1152_v22  ;;  %v3795_v14 = vpack.c.bf16 %v1447_v4, %v1443_v62  ;;  %v1449_v22 = vld [vmem:[#allocation9 + $0x170] sm:$0xff]  ;;  %v1451_v7 = vld [vmem:[#allocation9 + $0x180] sm:$0xff] }
 0x387   :  { %v1455_v8 = vld [vmem:[#allocation9 + $0x1a0] sm:$0xff] }
 0x388   :  { %3130 = vtanh.f32 %v3744_v25  ;;  %v3806_v17 = vpack.c.bf16 %v1455_v8, %v1451_v7 }
 0x392   :  { %v3131_v41 = vpop.eup %3130 }
 0x393   :  { %v1156_v55 = vmul.f32 %v3131_v41, %v3129_v27  ;;  %v1452_v27 = vld [vmem:[#allocation9 + $0x188] sm:$0xff]  ;;  %v3798_v41 = vpack.c.bf16 %v1449_v22, %v1445_v18 }
 0x395   :  { %1158 = vst [vmem:[#allocation12 + $0x10] sm:$0xff] %v1156_v55  ;;  %1292 = vmatmul.mubr.f32.vlgmr.msra.gmra.mrb[6].mxu0 %v1156_v55  ;;  %1363 = vmatmul.mubr.f32.vlgmr.msra.gmra.mrb[6].mxu1 %v1156_v55  ;;  %v1456_v55 = vld [vmem:[#allocation9 + $0x1a8] sm:$0xff] }
 0x396   :  { %2755 = vmatpush1.bf16.msra.mxu0 %v3693_v33  ;;  %2787 = vmatpush1.bf16.msra.mxu1 %v3696_v53  ;;  %v3801_v1 = vpack.c.bf16 %v1456_v55, %v1452_v27 }
 0x397   :  { %2757 = vmatprep.subr.bf16.mxu0 %v3701_v34  ;;  %2789 = vmatprep.subr.bf16.mxu1 %v3703_v45 }
 0x398   :  { %1531 = vmatprep.mubr.f32.mxu0 %v3384_v0  ;;  %1602 = vmatprep.mubr.f32.mxu1 %v3384_v0 }
 0x39a   :  { %2759 = vmatpush1.bf16.msra.mxu0 %v3705_v46  ;;  %2791 = vmatpush1.bf16.msra.mxu1 %v3708_v51 }
 0x39b   :  { %2761 = vmatprep.subr.bf16.mxu0 %v3755_v2  ;;  %2793 = vmatprep.subr.bf16.mxu1 %v3757_v11 }
 0x39e   :  { %2763 = vmatpush1.bf16.msra.mxu0 %v3759_v12  ;;  %2795 = vmatpush1.bf16.msra.mxu1 %v3762_v20 }
 0x39f   :  { %2765 = vmatprep.subr.bf16.mxu0 %v3767_v47  ;;  %2797 = vmatprep.subr.bf16.mxu1 %v3769_v63 }
 0x3a2   :  { %2767 = vmatpush1.bf16.msra.mxu0 %v3771_v39  ;;  %2799 = vmatpush1.bf16.msra.mxu1 %v3774_v49 }
 0x3a3   :  { %2769 = vmatprep.subr.bf16.mxu0 %v3779_v10  ;;  %2801 = vmatprep.subr.bf16.mxu1 %v3781_v23 }
 0x3a6   :  { %2771 = vmatpush1.bf16.msra.mxu0 %v3783_v26  ;;  %2803 = vmatpush1.bf16.msra.mxu1 %v3786_v36 }
 0x3a7   :  { %2773 = vmatprep.subr.bf16.mxu0 %v3790_v54  ;;  %2805 = vmatprep.subr.bf16.mxu1 %v3793_v9 }
 0x3aa   :  { %2775 = vmatpush1.bf16.msra.mxu0 %v3795_v14  ;;  %2807 = vmatpush1.bf16.msra.mxu1 %v3798_v41 }
 0x3ab   :  { %2777 = vmatprep.subr.bf16.mxu0 %v3801_v1  ;;  %2809 = vmatprep.subr.bf16.mxu1 %v3803_v5 }
 0x3ae   :  { %2779 = vmatpush1.bf16.msra.mxu0 %v3806_v17  ;;  %2811 = vmatpush1.bf16.msra.mxu1 %v3810_v50 }
 0x3af   :  { %2781 = vmatprep.subr.bf16.mxu0 %v3812_v56  ;;  %2813 = vmatprep.subr.bf16.mxu1 %v3815_v38 }
 0x3b2   :  { %2783 = vmatpush1.bf16.msra.mxu0 %v3818_v16  ;;  %2815 = vmatpush1.bf16.msra.mxu1 %v3822_v19 }
 0x3b3   :  { %2817 = vmatprep.subr.bf16.mxu0 %v3689_v21  ;;  %2849 = vmatprep.subr.bf16.mxu1 %v3691_v31 }
 0x468   :  { %v1293_v29 = vpop.f32.mrb[6].mxu0  ;;  %v1364_v32 = vpop.f32.mrb[6].mxu1 }
 0x469   :  { %v3014_v40 = vadd.f32 %v1293_v29, %v3632_v35  ;;  %v1295_v44 = vpop.f32.mrb[7].mxu0  ;;  %v1366_v48 = vpop.f32.mrb[7].mxu1  ;;  %v3030_v27 = vadd.f32 %v1364_v32, %v3641_v59 }
 0x46a   :  { %v3015_v58 = vadd.f32 %v1295_v44, %v3634_v37  ;;  %v3031_v18 = vadd.f32 %v1366_v48, %v3638_v52 }
 0x46b   :  { %v2417_v62 = vmul.f32 -1.442695, %v3014_v40 }
 0x46c   :  { %v2418_v4 = vmul.f32 -1.442695, %v3015_v58  ;;  %v2419_v22 = vmul.f32 -1.442695, %v3031_v18 }
 0x46d   :  { %3132 = vpow2.f32 %v2417_v62 }
 0x46e   :  { %3134 = vpow2.f32 %v2418_v4 }
 0x46f   :  { %3136 = vpow2.f32 %v2419_v22 }
 0x470   :  { %3138 = vtanh.f32 %v3030_v27 }
 0x477   :  { %v3133_v55 = vpop.eup %3132 }
 0x478   :  { %v3135_v57 = vpop.eup %3134  ;;  %v1376_v61 = vadd.f32 1.0, %v3133_v55 }
 0x479   :  { %v1382_v7 = vadd.f32 1.0, %v3135_v57  ;;  %v3137_v8 = vpop.eup %3136 }
 0x47a   :  { %3140 = vrcp.f32 %v1376_v61  ;;  %v3139_v15 = vpop.eup %3138  ;;  %v1389_v60 = vadd.f32 1.0, %v3137_v8 }
 0x47b   :  { %3142 = vrcp.f32 %v1382_v7 }
 0x47c   :  { %3144 = vrcp.f32 %v1389_v60 }
 0x484   :  { %v3141_v24 = vpop.eup %3140 }
 0x485   :  { %v3143_v28 = vpop.eup %3142  ;;  %v1393_v30 = vmul.f32 %v3141_v24, %v3139_v15 }
 0x486   :  { %v1392_v42 = vmul.f32 %v3143_v28, %v3744_v25  ;;  %v3145_v3 = vpop.eup %3144 }
 0x488   :  { %v3834_v43 = vadd.f32 %v1393_v30, %v1392_v42 }
 0x48a   :  { %3146 = vtanh.f32 %v3834_v43 }
 0x494   :  { %v3147_v6 = vpop.eup %3146 }
 0x495   :  { %v1396_v13 = vmul.f32 %v3147_v6, %v3145_v3 }
 0x497   :  { %1398 = vst [vmem:[#allocation12 + $0x18] sm:$0xff] %v1396_v13  ;;  %1532 = vmatmul.mubr.f32.vlgmr.msra.gmra.mrb[8].mxu0 %v1396_v13  ;;  %1603 = vmatmul.mubr.f32.vlgmr.msra.gmra.mrb[8].mxu1 %v1396_v13 }
 0x498   :  { %2819 = vmatpush1.bf16.msra.mxu0 %v3693_v33  ;;  %2851 = vmatpush1.bf16.msra.mxu1 %v3696_v53 }
 0x499   :  { %2821 = vmatprep.subr.bf16.mxu0 %v3701_v34  ;;  %2853 = vmatprep.subr.bf16.mxu1 %v3703_v45 }
 0x49a   :  { %1771 = vmatprep.mubr.f32.mxu0 %v3384_v0  ;;  %1842 = vmatprep.mubr.f32.mxu1 %v3384_v0 }
 0x49c   :  { %2823 = vmatpush1.bf16.msra.mxu0 %v3705_v46  ;;  %2855 = vmatpush1.bf16.msra.mxu1 %v3708_v51 }
 0x49d   :  { %2825 = vmatprep.subr.bf16.mxu0 %v3755_v2  ;;  %2857 = vmatprep.subr.bf16.mxu1 %v3757_v11 }
 0x4a0   :  { %2827 = vmatpush1.bf16.msra.mxu0 %v3759_v12  ;;  %2859 = vmatpush1.bf16.msra.mxu1 %v3762_v20 }
 0x4a1   :  { %2829 = vmatprep.subr.bf16.mxu0 %v3767_v47  ;;  %2861 = vmatprep.subr.bf16.mxu1 %v3769_v63 }
 0x4a4   :  { %2831 = vmatpush1.bf16.msra.mxu0 %v3771_v39  ;;  %2863 = vmatpush1.bf16.msra.mxu1 %v3774_v49 }
 0x4a5   :  { %2833 = vmatprep.subr.bf16.mxu0 %v3779_v10  ;;  %2865 = vmatprep.subr.bf16.mxu1 %v3781_v23 }
 0x4a8   :  { %2835 = vmatpush1.bf16.msra.mxu0 %v3783_v26  ;;  %2867 = vmatpush1.bf16.msra.mxu1 %v3786_v36 }
 0x4a9   :  { %2837 = vmatprep.subr.bf16.mxu0 %v3790_v54  ;;  %2869 = vmatprep.subr.bf16.mxu1 %v3793_v9 }
 0x4ac   :  { %2839 = vmatpush1.bf16.msra.mxu0 %v3795_v14  ;;  %2871 = vmatpush1.bf16.msra.mxu1 %v3798_v41 }
 0x4ad   :  { %2841 = vmatprep.subr.bf16.mxu0 %v3801_v1  ;;  %2873 = vmatprep.subr.bf16.mxu1 %v3803_v5 }
 0x4b0   :  { %2843 = vmatpush1.bf16.msra.mxu0 %v3806_v17  ;;  %2875 = vmatpush1.bf16.msra.mxu1 %v3810_v50 }
 0x4b1   :  { %2845 = vmatprep.subr.bf16.mxu0 %v3812_v56  ;;  %2877 = vmatprep.subr.bf16.mxu1 %v3815_v38 }
 0x4b4   :  { %2847 = vmatpush1.bf16.msra.mxu0 %v3818_v16  ;;  %2879 = vmatpush1.bf16.msra.mxu1 %v3822_v19 }
 0x4b5   :  { %2881 = vmatprep.subr.bf16.mxu0 %v3689_v21  ;;  %2913 = vmatprep.subr.bf16.mxu1 %v3691_v31 }
 0x56a   :  { %v1533_v25 = vpop.f32.mrb[8].mxu0  ;;  %v1604_v29 = vpop.f32.mrb[8].mxu1 }
 0x56b   :  { %v3016_v32 = vadd.f32 %v1533_v25, %v3632_v35  ;;  %v1535_v40 = vpop.f32.mrb[9].mxu0  ;;  %v1606_v44 = vpop.f32.mrb[9].mxu1  ;;  %v3032_v22 = vadd.f32 %v1604_v29, %v3641_v59 }
 0x56c   :  { %v3017_v48 = vadd.f32 %v1535_v40, %v3634_v37  ;;  %v3033_v4 = vadd.f32 %v1606_v44, %v3638_v52 }
 0x56d   :  { %v2420_v58 = vmul.f32 -1.442695, %v3016_v32 }
 0x56e   :  { %v2421_v62 = vmul.f32 -1.442695, %v3017_v48  ;;  %v2422_v18 = vmul.f32 -1.442695, %v3033_v4 }
 0x56f   :  { %3148 = vpow2.f32 %v2420_v58 }
 0x570   :  { %3150 = vpow2.f32 %v2421_v62 }
 0x571   :  { %3152 = vpow2.f32 %v2422_v18 }
 0x572   :  { %3154 = vtanh.f32 %v3032_v22 }
 0x579   :  { %v3149_v21 = vpop.eup %3148 }
 0x57a   :  { %v3151_v27 = vpop.eup %3150  ;;  %v1616_v31 = vadd.f32 1.0, %v3149_v21 }
 0x57b   :  { %v1622_v55 = vadd.f32 1.0, %v3151_v27  ;;  %v3153_v57 = vpop.eup %3152 }
 0x57c   :  { %3156 = vrcp.f32 %v1616_v31  ;;  %v3155_v61 = vpop.eup %3154  ;;  %v1629_v24 = vadd.f32 1.0, %v3153_v57 }
 0x57d   :  { %3158 = vrcp.f32 %v1622_v55 }
 0x57e   :  { %3160 = vrcp.f32 %v1629_v24 }
 0x586   :  { %v3157_v7 = vpop.eup %3156 }
 0x587   :  { %v3159_v8 = vpop.eup %3158  ;;  %v1633_v15 = vmul.f32 %v3157_v7, %v3155_v61  ;;  %v2124_v7 = vld [vmem:[#allocation9 + $0x8] sm:$0xff] }
 0x588   :  { %v1632_v28 = vmul.f32 %v3159_v8, %v3834_v43  ;;  %v3161_v60 = vpop.eup %3160  ;;  %v2128_v8 = vld [vmem:[#allocation9 + $0x28] sm:$0xff] }
 0x589   :  { %v2944_v24 = vpack.c.bf16 %v2128_v8, %v2124_v7 }
 0x58a   :  { %v3876_v30 = vadd.f32 %v1633_v15, %v1632_v28  ;;  %v2126_v15 = vld [vmem:[#allocation9 + $0x18] sm:$0xff] }
 0x58b   :  { %v2130_v28 = vld [vmem:[#allocation9 + $0x38] sm:$0xff] }
 0x58c   :  { %3162 = vtanh.f32 %v3876_v30 }
 0x596   :  { %v3163_v42 = vpop.eup %3162 }
 0x597   :  { %v1636_v3 = vmul.f32 %v3163_v42, %v3161_v60  ;;  %v2127_v60 = vld [vmem:[#allocation9 + $0x20] sm:$0xff]  ;;  %v2976_v42 = vpack.c.bf16 %v2130_v28, %v2126_v15 }
 0x599   :  { %1638 = vst [vmem:[#allocation12 + $0x20] sm:$0xff] %v1636_v3  ;;  %1772 = vmatmul.mubr.f32.vlgmr.msra.gmra.mrb[10].mxu0 %v1636_v3  ;;  %1843 = vmatmul.mubr.f32.vlgmr.msra.gmra.mrb[10].mxu1 %v1636_v3 }
 0x59a   :  { %2883 = vmatpush1.bf16.msra.mxu0 %v3693_v33  ;;  %2915 = vmatpush1.bf16.msra.mxu1 %v3696_v53 }
 0x59b   :  { %2885 = vmatprep.subr.bf16.mxu0 %v3701_v34  ;;  %2917 = vmatprep.subr.bf16.mxu1 %v3703_v45 }
 0x59c   :  { %2011 = vmatprep.mubr.f32.mxu0 %v3384_v0  ;;  %2082 = vmatprep.mubr.f32.mxu1 %v3384_v0 }
 0x59e   :  { %2887 = vmatpush1.bf16.msra.mxu0 %v3705_v46  ;;  %2919 = vmatpush1.bf16.msra.mxu1 %v3708_v51 }
 0x59f   :  { %2889 = vmatprep.subr.bf16.mxu0 %v3755_v2  ;;  %2921 = vmatprep.subr.bf16.mxu1 %v3757_v11 }
 0x5a2   :  { %2891 = vmatpush1.bf16.msra.mxu0 %v3759_v12  ;;  %2923 = vmatpush1.bf16.msra.mxu1 %v3762_v20 }
 0x5a3   :  { %2893 = vmatprep.subr.bf16.mxu0 %v3767_v47  ;;  %2925 = vmatprep.subr.bf16.mxu1 %v3769_v63 }
 0x5a6   :  { %2895 = vmatpush1.bf16.msra.mxu0 %v3771_v39  ;;  %2927 = vmatpush1.bf16.msra.mxu1 %v3774_v49 }
 0x5a7   :  { %2897 = vmatprep.subr.bf16.mxu0 %v3779_v10  ;;  %2929 = vmatprep.subr.bf16.mxu1 %v3781_v23 }
 0x5aa   :  { %2899 = vmatpush1.bf16.msra.mxu0 %v3783_v26  ;;  %2931 = vmatpush1.bf16.msra.mxu1 %v3786_v36 }
 0x5ab   :  { %2901 = vmatprep.subr.bf16.mxu0 %v3790_v54  ;;  %2933 = vmatprep.subr.bf16.mxu1 %v3793_v9 }
 0x5ae   :  { %2903 = vmatpush1.bf16.msra.mxu0 %v3795_v14  ;;  %2935 = vmatpush1.bf16.msra.mxu1 %v3798_v41 }
 0x5af   :  { %2905 = vmatprep.subr.bf16.mxu0 %v3801_v1  ;;  %2937 = vmatprep.subr.bf16.mxu1 %v3803_v5 }
 0x5b2   :  { %2907 = vmatpush1.bf16.msra.mxu0 %v3806_v17  ;;  %2939 = vmatpush1.bf16.msra.mxu1 %v3810_v50 }
 0x5b3   :  { %2909 = vmatprep.subr.bf16.mxu0 %v3812_v56  ;;  %2941 = vmatprep.subr.bf16.mxu1 %v3815_v38 }
 0x5b6   :  { %2911 = vmatpush1.bf16.msra.mxu0 %v3818_v16  ;;  %2943 = vmatpush1.bf16.msra.mxu1 %v3822_v19 }
 0x5b7   :  { %2945 = vmatprep.subr.bf16.mxu0 %v2944_v24  ;;  %2977 = vmatprep.subr.bf16.mxu1 %v2976_v42 }
 0x66c   :  { %v1773_v33 = vpop.f32.mrb[10].mxu0  ;;  %v1844_v53 = vpop.f32.mrb[10].mxu1 }
 0x66d   :  { %v3018_v34 = vadd.f32 %v1773_v33, %v3632_v35  ;;  %v1775_v45 = vpop.f32.mrb[11].mxu0  ;;  %v1846_v46 = vpop.f32.mrb[11].mxu1  ;;  %v3034_v29 = vadd.f32 %v1844_v53, %v3641_v59  ;;  %v2125_v33 = vld [vmem:[#allocation9 + $0x10] sm:$0xff] }
 0x66e   :  { %v3019_v51 = vadd.f32 %v1775_v45, %v3634_v37  ;;  %v3035_v13 = vadd.f32 %v1846_v46, %v3638_v52  ;;  %v2129_v53 = vld [vmem:[#allocation9 + $0x30] sm:$0xff]  ;;  %v2132_v45 = vld [vmem:[#allocation9 + $0x48] sm:$0xff] }
 0x66f   :  { %v2423_v43 = vmul.f32 -1.442695, %v3018_v34  ;;  %v2978_v34 = vpack.c.bf16 %v2129_v53, %v2125_v33  ;;  %v2136_v46 = vld [vmem:[#allocation9 + $0x68] sm:$0xff] }
 0x670   :  { %v2424_v6 = vmul.f32 -1.442695, %v3019_v51  ;;  %v2425_v25 = vmul.f32 -1.442695, %v3035_v13  ;;  %v2134_v51 = vld [vmem:[#allocation9 + $0x58] sm:$0xff]  ;;  %v2135_v13 = vld [vmem:[#allocation9 + $0x60] sm:$0xff] }
 0x671   :  { %3164 = vpow2.f32 %v2423_v43  ;;  %v2138_v43 = vld [vmem:[#allocation9 + $0x78] sm:$0xff] }
 0x672   :  { %3166 = vpow2.f32 %v2424_v6  ;;  %v2131_v6 = vld [vmem:[#allocation9 + $0x40] sm:$0xff] }
 0x673   :  { %3168 = vpow2.f32 %v2425_v25  ;;  %v2980_v25 = vpack.c.bf16 %v2138_v43, %v2134_v51 }
 0x674   :  { %3170 = vtanh.f32 %v3034_v29  ;;  %v2950_v29 = vpack.c.bf16 %v2135_v13, %v2131_v6 }
 0x67b   :  { %v3165_v32 = vpop.eup %3164 }
 0x67c   :  { %v3167_v40 = vpop.eup %3166  ;;  %v1856_v44 = vadd.f32 1.0, %v3165_v32  ;;  %v2133_v32 = vld [vmem:[#allocation9 + $0x50] sm:$0xff] }
 0x67d   :  { %v1862_v48 = vadd.f32 1.0, %v3167_v40  ;;  %v3169_v58 = vpop.eup %3168  ;;  %v2137_v40 = vld [vmem:[#allocation9 + $0x70] sm:$0xff] }
 0x67e   :  { %3172 = vrcp.f32 %v1856_v44  ;;  %v3171_v62 = vpop.eup %3170  ;;  %v1869_v21 = vadd.f32 1.0, %v3169_v58  ;;  %v2982_v44 = vpack.c.bf16 %v2137_v40, %v2133_v32 }
 0x67f   :  { %3174 = vrcp.f32 %v1862_v48 }
 0x680   :  { %3176 = vrcp.f32 %v1869_v21 }
 0x688   :  { %v3173_v4 = vpop.eup %3172 }
 0x689   :  { %v3175_v18 = vpop.eup %3174  ;;  %v1873_v22 = vmul.f32 %v3173_v4, %v3171_v62 }
 0x68a   :  { %v1872_v27 = vmul.f32 %v3175_v18, %v3876_v30  ;;  %v3177_v55 = vpop.eup %3176  ;;  %v2123_v30 = vld [vmem:[#allocation9] sm:$0xff] }
 0x68b   :  { %v2946_v3 = vpack.c.bf16 %v2127_v60, %v2123_v30 }
 0x68c   :  { %v3916_v31 = vadd.f32 %v1873_v22, %v1872_v27 }
 0x68e   :  { %3178 = vtanh.f32 %v3916_v31 }
 0x698   :  { %v3179_v57 = vpop.eup %3178 }
 0x699   :  { %v1876_v61 = vmul.f32 %v3179_v57, %v3177_v55 }
 0x69b   :  { %1878 = vst [vmem:[#allocation12 + $0x28] sm:$0xff] %v1876_v61  ;;  %2012 = vmatmul.mubr.f32.vlgmr.msra.gmra.mrb[12].mxu0 %v1876_v61  ;;  %2083 = vmatmul.mubr.f32.vlgmr.msra.gmra.mrb[12].mxu1 %v1876_v61 }
 0x69c   :  { %2251 = vmatprep.mubr.f32.mxu0 %v3384_v0  ;;  %2322 = vmatprep.mubr.f32.mxu1 %v3384_v0  ;;  %v2948_v0 = vpack.c.bf16 %v2136_v46, %v2132_v45 }
 0x69d   :  { %2947 = vmatpush1.bf16.msra.mxu0 %v2946_v3  ;;  %2979 = vmatpush1.bf16.msra.mxu1 %v2978_v34 }
 0x69e   :  { %2949 = vmatprep.subr.bf16.mxu0 %v2948_v0  ;;  %2981 = vmatprep.subr.bf16.mxu1 %v2980_v25 }
 0x6a1   :  { %2951 = vmatpush1.bf16.msra.mxu0 %v2950_v29  ;;  %2983 = vmatpush1.bf16.msra.mxu1 %v2982_v44 }
 0x6a2   :  { %2953 = vmatprep.subr.bf16.mxu0 %v3755_v2  ;;  %2985 = vmatprep.subr.bf16.mxu1 %v3757_v11 }
 0x6a5   :  { %2955 = vmatpush1.bf16.msra.mxu0 %v3759_v12  ;;  %2987 = vmatpush1.bf16.msra.mxu1 %v3762_v20 }
 0x6a6   :  { %2957 = vmatprep.subr.bf16.mxu0 %v3767_v47  ;;  %2989 = vmatprep.subr.bf16.mxu1 %v3769_v63 }
 0x6a9   :  { %2959 = vmatpush1.bf16.msra.mxu0 %v3771_v39  ;;  %2991 = vmatpush1.bf16.msra.mxu1 %v3774_v49 }
 0x6aa   :  { %2961 = vmatprep.subr.bf16.mxu0 %v3779_v10  ;;  %2993 = vmatprep.subr.bf16.mxu1 %v3781_v23 }
 0x6ad   :  { %2963 = vmatpush1.bf16.msra.mxu0 %v3783_v26  ;;  %2995 = vmatpush1.bf16.msra.mxu1 %v3786_v36 }
 0x6ae   :  { %2965 = vmatprep.subr.bf16.mxu0 %v3790_v54  ;;  %2997 = vmatprep.subr.bf16.mxu1 %v3793_v9 }
 0x6b1   :  { %2967 = vmatpush1.bf16.msra.mxu0 %v3795_v14  ;;  %2999 = vmatpush1.bf16.msra.mxu1 %v3798_v41 }
 0x6b2   :  { %2969 = vmatprep.subr.bf16.mxu0 %v3801_v1  ;;  %3001 = vmatprep.subr.bf16.mxu1 %v3803_v5 }
 0x6b5   :  { %2971 = vmatpush1.bf16.msra.mxu0 %v3806_v17  ;;  %3003 = vmatpush1.bf16.msra.mxu1 %v3810_v50 }
 0x6b6   :  { %2973 = vmatprep.subr.bf16.mxu0 %v3812_v56  ;;  %3005 = vmatprep.subr.bf16.mxu1 %v3815_v38 }
 0x6b9   :  { %2975 = vmatpush1.bf16.msra.mxu0 %v3818_v16  ;;  %3007 = vmatpush1.bf16.msra.mxu1 %v3822_v19 }
 0x76e   :  { %v2013_v2 = vpop.f32.mrb[12].mxu0  ;;  %v2084_v11 = vpop.f32.mrb[12].mxu1 }
 0x76f   :  { %v3020_v12 = vadd.f32 %v2013_v2, %v3632_v35  ;;  %v2015_v20 = vpop.f32.mrb[13].mxu0  ;;  %v2086_v47 = vpop.f32.mrb[13].mxu1  ;;  %v3036_v26 = vadd.f32 %v2084_v11, %v3641_v59 }
 0x770   :  { %v3021_v63 = vadd.f32 %v2015_v20, %v3634_v37  ;;  %v3037_v10 = vadd.f32 %v2086_v47, %v3638_v52 }
 0x771   :  { %v2426_v39 = vmul.f32 -1.442695, %v3020_v12 }
 0x772   :  { %v2427_v49 = vmul.f32 -1.442695, %v3021_v63  ;;  %v2428_v23 = vmul.f32 -1.442695, %v3037_v10 }
 0x773   :  { %3180 = vpow2.f32 %v2426_v39 }
 0x774   :  { %3182 = vpow2.f32 %v2427_v49 }
 0x775   :  { %3184 = vpow2.f32 %v2428_v23 }
 0x776   :  { %3186 = vtanh.f32 %v3036_v26 }
 0x77d   :  { %v3181_v36 = vpop.eup %3180 }
 0x77e   :  { %v3183_v54 = vpop.eup %3182  ;;  %v2096_v9 = vadd.f32 1.0, %v3181_v36 }
 0x77f   :  { %v2102_v14 = vadd.f32 1.0, %v3183_v54  ;;  %v3185_v41 = vpop.eup %3184 }
 0x780   :  { %3188 = vrcp.f32 %v2096_v9  ;;  %v3187_v1 = vpop.eup %3186  ;;  %v2109_v56 = vadd.f32 1.0, %v3185_v41 }
 0x781   :  { %3190 = vrcp.f32 %v2102_v14 }
 0x782   :  { %3192 = vrcp.f32 %v2109_v56 }
 0x78a   :  { %v3189_v5 = vpop.eup %3188 }
 0x78b   :  { %v3191_v17 = vpop.eup %3190  ;;  %v2113_v50 = vmul.f32 %v3189_v5, %v3187_v1 }
 0x78c   :  { %v2112_v38 = vmul.f32 %v3191_v17, %v3916_v31  ;;  %v3193_v19 = vpop.eup %3192 }
 0x78e   :  { %v2114_v16 = vadd.f32 %v2113_v50, %v2112_v38 }
 0x790   :  { %3194 = vtanh.f32 %v2114_v16 }
 0x79a   :  { %v3195_v48 = vpop.eup %3194 }
 0x79b   :  { %v2116_v58 = vmul.f32 %v3195_v48, %v3193_v19 }
 0x79d   :  { %2118 = vst [vmem:[#allocation12 + $0x30] sm:$0xff] %v2116_v58  ;;  %2252 = vmatmul.mubr.f32.vlgmr.msra.gmra.mrb[14].mxu0 %v2116_v58  ;;  %2323 = vmatmul.mubr.f32.vlgmr.msra.gmra.mrb[14].mxu1 %v2116_v58 }
 0x870   :  { %v2253_v62 = vpop.f32.mrb[14].mxu0  ;;  %v2324_v4 = vpop.f32.mrb[14].mxu1 }
 0x871   :  { %v3022_v18 = vadd.f32 %v2253_v62, %v3632_v35  ;;  %v2255_v22 = vpop.f32.mrb[15].mxu0  ;;  %v2326_v21 = vpop.f32.mrb[15].mxu1  ;;  %v3038_v7 = vadd.f32 %v2324_v4, %v3641_v59 }
 0x872   :  { %v3023_v27 = vadd.f32 %v2255_v22, %v3634_v37  ;;  %v3039_v31 = vadd.f32 %v2326_v21, %v3638_v52 }
 0x873   :  { %v2429_v55 = vmul.f32 -1.442695, %v3022_v18 }
 0x874   :  { %v2430_v57 = vmul.f32 -1.442695, %v3023_v27  ;;  %v2431_v61 = vmul.f32 -1.442695, %v3039_v31 }
 0x875   :  { %3196 = vpow2.f32 %v2429_v55 }
 0x876   :  { %3198 = vpow2.f32 %v2430_v57 }
 0x877   :  { %3200 = vpow2.f32 %v2431_v61 }
 0x878   :  { %3202 = vtanh.f32 %v3038_v7 }
 0x87f   :  { %v3197_v8 = vpop.eup %3196 }
 0x880   :  { %v3199_v15 = vpop.eup %3198  ;;  %v2336_v24 = vadd.f32 1.0, %v3197_v8 }
 0x881   :  { %v2342_v28 = vadd.f32 1.0, %v3199_v15  ;;  %v3201_v35 = vpop.eup %3200 }
 0x882   :  { %3204 = vrcp.f32 %v2336_v24  ;;  %v3203_v30 = vpop.eup %3202  ;;  %v2349_v3 = vadd.f32 1.0, %v3201_v35 }
 0x883   :  { %3206 = vrcp.f32 %v2342_v28 }
 0x884   :  { %3208 = vrcp.f32 %v2349_v3 }
 0x88c   :  { %v3205_v37 = vpop.eup %3204 }
 0x88d   :  { %v3207_v60 = vpop.eup %3206  ;;  %v2353_v42 = vmul.f32 %v3205_v37, %v3203_v30 }
 0x88e   :  { %v2352_v33 = vmul.f32 %v3207_v60, %v2114_v16  ;;  %v3209_v52 = vpop.eup %3208 }
 0x890   :  { %v2354_v53 = vadd.f32 %v2353_v42, %v2352_v33 }
 0x892   :  { %2360 = vst [vmem:[#allocation15] sm:$0xff] %v2354_v53  ;;  %3210 = vtanh.f32 %v2354_v53 }
 0x89c   :  { %v3211_v59 = vpop.eup %3210 }
 0x89d   :  { %v2356_v34 = vmul.f32 %v3211_v59, %v3209_v52 }
 0x89f   :  { %2358 = vst [vmem:[#allocation12 + $0x38] sm:$0xff] %v2356_v34  ;;  %2359 = vst [vmem:[#allocation13] sm:$0xff] %v2356_v34 }
 0x8a0   :  { %3311 = shalt.err (!%p3308_p8)
}
 0x8a1   :  { %s3312_s9 = scalar_lea.hbm %s4012_s5, 128 }
 0x8a2   :  { %p3313_p9 = scmp.ne.s32.totalorder %s4012_s5, %s3312_s9  ;;  %p3316_p10 = scmp.lt.u32.totalorder %s3312_s9, %s4012_s5 }
 0x8a4   :  { %p3318_p11 = pnand %p3316_p10, %p3313_p9 }
 0x8a6   :  { %3321 = shalt.err (!%p3318_p11)
}
 0x8a7   :  { %2383 = dma.vmem_to_hbm [thread:$0]  %s2381_s8, 128, %s4012_s5, [#allocation14]  }
 0x8a8   :  { %s3322_s15 = scalar_lea.vmem %s3954_s25, 1024  ;;  %p3327_p13 = scmp.lt.s32.totalorder %s3954_s25, %s3954_s25 }
 0x8a9   :  { %p3323_p12 = scmp.ne.s32.totalorder %s3954_s25, %s3322_s15  ;;  %p3328_p0 = scmp.lt.s32.totalorder %s3322_s15, %s3322_s15 }
 0x8ab   :  { %p3329_p1 = por %p3328_p0, %p3327_p13 }
 0x8ad   :  { %p3330_p2 = pnand %p3329_p1, %p3323_p12 }
 0x8af   :  { %3333 = shalt.err (!%p3330_p2)
}
 0x8b0   :  { %s3334_s18 = scalar_lea.hbm %s4011_s4, 1024 }
 0x8b1   :  { %p3335_p3 = scmp.ne.s32.totalorder %s4011_s4, %s3334_s18  ;;  %p3338_p4 = scmp.lt.u32.totalorder %s3334_s18, %s4011_s4 }
 0x8b3   :  { %p3340_p5 = pnand %p3338_p4, %p3335_p3 }
 0x8b5   :  { %3343 = shalt.err (!%p3340_p5)
}
 0x8b6   :  { %2373 = dma.vmem_to_hbm [thread:$0]  %s3954_s25, 1024, %s4011_s4, [#allocation6], %s3380_s1, %s3380_s1, %s3381_s21  }
 0x8b7   :  { %s3344_s7 = scalar_lea.vmem %s3956_s27, 128  ;;  %p3349_p7 = scmp.lt.s32.totalorder %s3956_s27, %s3956_s27 }
 0x8b8   :  { %p3345_p6 = scmp.ne.s32.totalorder %s3956_s27, %s3344_s7  ;;  %p3350_p8 = scmp.lt.s32.totalorder %s3344_s7, %s3344_s7 }
 0x8ba   :  { %p3351_p9 = por %p3350_p8, %p3349_p7 }
 0x8bc   :  { %p3352_p10 = pnand %p3351_p9, %p3345_p6 }
 0x8be   :  { %3355 = shalt.err (!%p3352_p10)
}
 0x8bf   :  { %s3356_s24 = scalar_lea.hbm %s4013_s6, 128 }
 0x8c0   :  { %p3357_p11 = scmp.ne.s32.totalorder %s4013_s6, %s3356_s24  ;;  %p3360_p12 = scmp.lt.u32.totalorder %s3356_s24, %s4013_s6 }
 0x8c2   :  { %p3362_p13 = pnand %p3360_p12, %p3357_p11 }
 0x8c4   :  { %3365 = shalt.err (!%p3362_p13)
}
 0x8c5   :  { %2393 = dma.vmem_to_hbm [thread:$0]  %s3956_s27, 128, %s4013_s6, [#allocation14]  }
 0x8c6   :  { %3372 = dma.done.wait [#allocation6], 1024  }
 0x8c7   :  { %3373 = vsyncadd [#allocation6], 4294966272 }
 0x8c8   :  { %3374 = dma.done.wait [#allocation14], 256  }
 0x8c9   :  { %3375 = vsyncadd [#allocation14], 4294967040 }
 0x8ca   :  { %2403 = vsyncpa [#allocation5], 1 }
 0x8cb   :  { %2404 = vsyncpa [#allocation8], 1 }
 0x8cc   :  { %2405 = vsyncpa [#allocation11], 1 }
 0x8cd   :  { %2406 = vsyncpa [#allocation6], 1 }
 0x8ce   :  { %2407 = vsyncpa [#allocation14], 1 }

</bundles_post_ra>
